<compile_context>
chip_gen: v5e
topology: v5e:2x2
jax: 0.10.0
libtpu: 0.0.40
codegen_flags: <defaults>
</compile_context>

<pallas_src>
import functools

import numpy as np
import jax
import jax.numpy as jnp
from jax import lax
from jax.experimental import pallas as pl
from jax.experimental.pallas import tpu as pltpu


# ----------------------------------------------------------------------------
# sym5 filter bank (10-tap symlet-5 decomposition low-pass), hardcoded.
# High-pass via the quadrature-mirror relation.
# ----------------------------------------------------------------------------
SYM5_DEC_LO = np.array([
    0.027333068345077982, 0.029519490925774643, -0.039134249302383094,
    0.1993975339773936, 0.7234076904024206, 0.6339789634582119,
    0.01660210576452232, -0.17532808990845047, -0.021101834024758855,
    0.019538882735286728], dtype=np.float64)
_L = len(SYM5_DEC_LO)                       # 10 taps
SYM5_DEC_HI = np.array(
    [((-1.0) ** k) * SYM5_DEC_LO[_L - 1 - k] for k in range(_L)],
    dtype=np.float64)

_PAD = _L - 1        # symmetric-extension width per side (9)
_BLK = 128           # output coefficients produced per MXU matmul (one lane tile)
_WIN = 3 * _BLK      # input window lanes per output block (2*128 + taps, vreg aligned)
_OFF = 128           # lane offset of sample 0 inside every signal buffer


def _round_up(a, b):
    return ((a + b - 1) // b) * b


def _cdiv(a, b):
    return -(-a // b)


def _sym_reflect(idx, n):
    """'symmetric' boundary extension index map (edge value repeated)."""
    idx = int(np.mod(idx, 2 * n))
    return 2 * n - 1 - idx if idx >= n else idx


# ----------------------------------------------------------------------------
# Dense reference operator (host-side, f64) — used only for the self-check.
# ----------------------------------------------------------------------------
def _dwt_step_matrix(n, filt):
    L = len(filt)
    p = L - 1
    n_out = (n + L - 1) // 2
    M = np.zeros((n_out, n), dtype=np.float64)
    for i in range(n_out):
        m = 2 * i + 1                      # keep odd-indexed full-conv outputs
        for k in range(L):
            src = _sym_reflect(m + k - p, n)
            M[i, src] += filt[L - 1 - k]   # convolution => flipped filter
    return M


@functools.lru_cache(maxsize=None)
def build_wavedec_matrix(n, level):
    """Dense matrix mapping a length-n signal to flat [cA_L, cD_L, ..., cD_1]."""
    cur = np.eye(n, dtype=np.float64)
    cur_n = n
    details = []
    for _ in range(level):
        A = _dwt_step_matrix(cur_n, SYM5_DEC_LO)
        D = _dwt_step_matrix(cur_n, SYM5_DEC_HI)
        details.append(D @ cur)
        cur = A @ cur
        cur_n = cur.shape[0]
    blocks = [cur] + details[::-1]          # pywt order: cA_L, cD_L, ..., cD_1
    return np.concatenate(blocks, axis=0)   # (T, n)


# ----------------------------------------------------------------------------
# Static per-call metadata
# ----------------------------------------------------------------------------
@functools.lru_cache(maxsize=None)
def _level_plan(n, level):
    """Per-level (n_in, n_out, nblocks, detail_offset) + total coeff count."""
    assert level >= 1
    sizes, cur = [], n
    for _ in range(level):
        nxt = (cur + _L - 1) // 2
        sizes.append((cur, nxt))
        cur = nxt
    total = cur + sum(o for _, o in sizes)
    det_off = [0] * level                   # flat layout: [cA_L | cD_L | .. | cD_1]
    pos = cur
    for lvl in range(level - 1, -1, -1):
        det_off[lvl] = pos
        pos += sizes[lvl][1]
    assert pos == total
    plan = tuple((n_in, n_out, _cdiv(n_out, _BLK), det_off[i])
                 for i, (n_in, n_out) in enumerate(sizes))
    return plan, total


@functools.lru_cache(maxsize=None)
def _banded_step_matrix():
    """(384, 256) banded stride-2 conv operator; cols [:128]=low-pass, [128:]=high-pass.

    Window lane w of block j holds extended-signal sample s = 256*j + w - 128,
    and out[j*128 + i] = sum_k h[9-k] * ext(2*(j*128+i) - 8 + k), hence
    M[2*i + 120 + k, i] = h[9-k].  Same matrix for every block / every level.
    """
    m = np.zeros((_WIN, 2 * _BLK), dtype=np.float32)
    base = _OFF - (_L - 2)                  # 120
    for i in range(_BLK):
        for k in range(_L):
            w = 2 * i + base + k
            m[w, i] += SYM5_DEC_LO[_L - 1 - k]
            m[w, _BLK + i] += SYM5_DEC_HI[_L - 1 - k]
    return jnp.asarray(m)


# ----------------------------------------------------------------------------
# Generation-aware VMEM budgets (v7x: 64 MiB / TC, v5e/v6e: 128 MiB)
# ----------------------------------------------------------------------------
@functools.lru_cache(maxsize=None)
def _vmem_cap():
    try:
        info = pltpu.get_tpu_info()
        cap = (getattr(info, "vmem_capacity_bytes", None)
               or getattr(info, "vmem_size_bytes", None))
        if cap:
            return int(cap)
    except Exception:  # pragma: no cover - conservative fallback (v7x size)
        pass
    return 64 * 1024 * 1024


def _vmem_budget():
    # ~24 MiB on v7x, ~48 MiB on v5e/v6e.
    return max(16 << 20, _vmem_cap() * 3 // 8)


# ----------------------------------------------------------------------------
# Kernel A: banded multi-level sym5 DWT cascade, fully VMEM resident
# ----------------------------------------------------------------------------
def _dwt_cascade_kernel(x_ref, m_ref, out_ref, sig_a, sig_b, *, plan):
    """x_ref : (d_pad, w_buf) f32, signal at lanes [_OFF, _OFF+N) with the
               level-1 symmetric-extension pad already baked in.
       m_ref : (_WIN, 2*_BLK) f32 banded operator (lo | hi).
       out_ref: (d_pad, t_pad) f32 flat coefficients [cA_L | cD_L | .. | cD_1].
       sig_a/b: ping-pong buffers for the per-level approximations."""
    # Zero-init so un-written lanes can never feed a NaN into the MXU.
    sig_a[...] = jnp.zeros_like(sig_a)
    sig_b[...] = jnp.zeros_like(sig_b)
    m = m_ref[...]
    scratch = (sig_a, sig_b)
    n_levels = len(plan)

    for li, (n_in, n_out, nblocks, det_off) in enumerate(plan):
        src = x_ref if li == 0 else scratch[(li - 1) % 2]
        last = li == n_levels - 1
        dst = out_ref if last else scratch[li % 2]
        a_base = 0 if last else _OFF        # cA_L goes to flat offset 0

        def do_block(j, valid):
            start = j * 2 * _BLK
            if not isinstance(start, int):
                start = pl.multiple_of(start, 2 * _BLK)
            win = src[:, pl.ds(start, _WIN)]                       # (d_pad, 384)
            both = jnp.dot(win, m, preferred_element_type=jnp.float32)
            dst[:, pl.ds(a_base + j * _BLK, valid)] = both[:, :valid]
            out_ref[:, pl.ds(det_off + j * _BLK, valid)] = both[:, _BLK:_BLK + valid]

        full = n_out // _BLK
        tail = n_out - full * _BLK
        if full <= 4:                       # short levels: unroll statically
            for j in range(full):
                do_block(j, _BLK)
        else:                               # long levels: bounded trace size
            lax.fori_loop(0, full, lambda j, c: (do_block(j, _BLK), c)[1], 0)
        if tail:
            do_block(full, tail)

        if not last:
            # Symmetric-extension pad for the next level (static lane indices).
            for t in range(_PAD):
                ls = _sym_reflect(-1 - t, n_out)
                dst[:, _OFF - 1 - t:_OFF - t] = dst[:, _OFF + ls:_OFF + ls + 1]
                rs = _sym_reflect(n_out + t, n_out)
                dst[:, _OFF + n_out + t:_OFF + n_out + t + 1] = \
                    dst[:, _OFF + rs:_OFF + rs + 1]


def dwt_cascade(x_buf, m_mat, *, plan, t_pad):
    d_pad, w_buf = x_buf.shape
    flops = int(sum(2 * d_pad * _WIN * 2 * _BLK * nb for (_, _, nb, _) in plan))
    bytes_accessed = int((x_buf.size + m_mat.size + d_pad * t_pad) * 4)
    vmem_need = 4 * (2 * x_buf.size + 2 * m_mat.size + 2 * d_pad * t_pad
                     + 2 * d_pad * w_buf)
    vmem_limit = int(min(_vmem_cap() - (4 << 20),
                         max(vmem_need + (4 << 20), 16 << 20)))
    kernel = functools.partial(_dwt_cascade_kernel, plan=plan)
    return pl.pallas_call(
        kernel,
        out_shape=jax.ShapeDtypeStruct((d_pad, t_pad), jnp.float32),
        grid=(1,),
        in_specs=[
            pl.BlockSpec((d_pad, w_buf), lambda i: (0, 0)),        # whole signal
            pl.BlockSpec((_WIN, 2 * _BLK), lambda i: (0, 0)),      # banded operator
        ],
        out_specs=pl.BlockSpec((d_pad, t_pad), lambda i: (0, 0)),
        scratch_shapes=[pltpu.VMEM((d_pad, w_buf), jnp.float32),
                        pltpu.VMEM((d_pad, w_buf), jnp.float32)],
        compiler_params=pltpu.CompilerParams(
            dimension_semantics=("arbitrary",),
            vmem_limit_bytes=vmem_limit),
        cost_estimate=pl.CostEstimate(flops=flops, transcendentals=0,
                                      bytes_accessed=bytes_accessed),
    )(x_buf, m_mat)


# ----------------------------------------------------------------------------
# Kernel B: fused epilogue  out[i, :] = [x[i, :D], flat_coeffs]  (row-tiled)
# ----------------------------------------------------------------------------
def _epilogue_kernel(x_ref, c_ref, o_ref):
    blk_n = o_ref.shape[0]
    d = x_ref.shape[1]
    # Row-invariant lane-dense slab: one full-width (unmasked) store per row tile.
    o_ref[...] = jnp.broadcast_to(c_ref[...], (blk_n, c_ref.shape[1])).astype(o_ref.dtype)
    # Then overwrite the leading D lanes with the per-row positions.
    o_ref[:, :d] = x_ref[...].astype(o_ref.dtype)


def fused_concat_broadcast(x, coeff_row, out_dtype):
    n, d = x.shape
    dtd = coeff_row.shape[1]
    out_bytes = jnp.dtype(out_dtype).itemsize
    coeff_bytes = dtd * coeff_row.dtype.itemsize
    per_row = 2 * (dtd * out_bytes + d * x.dtype.itemsize)   # double-buffered tiles
    budget = _vmem_budget()
    budget_rows = max(8, (budget - coeff_bytes) // max(per_row, 1))
    nblk = _cdiv(n, budget_rows)
    blk = _round_up(_cdiv(n, nblk), 8)          # bounded block, never the full array
    n_pad = _round_up(n, blk)
    x_p = x if n_pad == n else jnp.concatenate(
        [x, jnp.zeros((n_pad - n, d), x.dtype)], axis=0)
    grid = (n_pad // blk,)
    bytes_accessed = int(n_pad * d * x.dtype.itemsize + coeff_bytes
                         + n_pad * dtd * out_bytes)
    vmem_limit = int(min(_vmem_cap() - (4 << 20), budget + (8 << 20)))
    # TODO(synk): v7x — use pltpu.CORE_PARALLEL here to shard rows over both TCs.
    out = pl.pallas_call(
        _epilogue_kernel,
        out_shape=jax.ShapeDtypeStruct((n_pad, dtd), out_dtype),
        grid=grid,
        in_specs=[
            pl.BlockSpec((blk, d), lambda i: (i, 0)),
            pl.BlockSpec((1, dtd), lambda i: (0, 0)),    # VMEM resident across grid
        ],
        out_specs=pl.BlockSpec((blk, dtd), lambda i: (i, 0)),
        compiler_params=pltpu.CompilerParams(
            dimension_semantics=("parallel",),
            vmem_limit_bytes=vmem_limit),
        cost_estimate=pl.CostEstimate(flops=0, transcendentals=0,
                                      bytes_accessed=bytes_accessed),
    )(x_p, coeff_row)
    return out if n_pad == n else out[:n]


# ----------------------------------------------------------------------------
# PositionalEncoder.forward equivalent
# ----------------------------------------------------------------------------
@functools.partial(jax.jit, static_argnames=("num_bands", "dimensionality", "out_dtype"))
def positional_encoder_forward(x, *, num_bands, dimensionality, out_dtype=None):
    """x: (N, F) float32 -> (N, D + T*D), D = dimensionality, T = #wavedec coeffs."""
    x = x[..., :dimensionality].astype(jnp.float32)
    n, d = x.shape
    out_dtype = jnp.dtype(out_dtype) if out_dtype is not None else x.dtype
    d_pad = max(8, _round_up(d, 8))

    plan, total = _level_plan(n, num_bands)
    t_pad = _round_up(total, _BLK)
    w_buf = _round_up(max(2 * _BLK * plan[0][2] + _OFF, _OFF + n + _PAD), _BLK)

    # Lane-dense signal slab (features on sublanes, samples on lanes) with the
    # level-1 symmetric-extension pad baked in; built once by XLA (O(N*D) bytes).
    xt = x.T
    left_src = np.array([_sym_reflect(s, n) for s in range(-_PAD, 0)], np.int32)
    right_src = np.array([_sym_reflect(n + t, n) for t in range(_PAD)], np.int32)
    x_buf = jnp.zeros((d_pad, w_buf), jnp.float32)
    x_buf = x_buf.at[:d, _OFF:_OFF + n].set(xt)
    x_buf = x_buf.at[:d, _OFF - _PAD:_OFF].set(xt[:, left_src])
    x_buf = x_buf.at[:d, _OFF + n:_OFF + n + _PAD].set(xt[:, right_src])

    # Hot path 1: banded multi-level DWT cascade (O(N*D) HBM traffic, f32).
    c_t = dwt_cascade(x_buf, _banded_step_matrix(), plan=plan, t_pad=t_pad)

    # flatten(start_dim=-2) of stack(coeffs, -1): flat[t*D + d] = C[t, d] = C^T[d, t].
    flat = c_t[:d, :total].T.reshape(1, total * d)
    coeff_row = jnp.concatenate(
        [jnp.zeros((1, d), jnp.float32), flat], axis=-1).astype(out_dtype)

    # Hot path 2: fused broadcast + concat, one lane-dense HBM write of the output.
    return fused_concat_broadcast(x, coeff_row, out_dtype)


if __name__ == "__main__":
    key = jax.random.PRNGKey(0)

    # Small config consistent with the module:
    N, F = 16, 6            # signal length, raw input feature dim
    dimensionality = 4      # config.pos_input_dim
    num_bands = 3           # config.pos_encoding_band  (wavedec level)

    x = jax.random.normal(key, (N, F), dtype=jnp.float32)

    out = positional_encoder_forward(
        x, num_bands=num_bands, dimensionality=dimensionality)
    out = jax.block_until_ready(out)

    # Independent host reference: dense f64 wavedec operator (same filter bank
    # and boundary rule, composed once) applied to x; the kernel instead runs
    # the banded per-level cascade in f32.
    W_np = build_wavedec_matrix(N, num_bands)                        # (T, N) f64
    x_np = np.asarray(x[:, :dimensionality], dtype=np.float64)       # (N, D)
    coeffs = W_np @ x_np                                             # (T, D)
    flat_ref = coeffs.reshape(-1)                                    # t*D + d
    ref_out = np.concatenate(
        [x_np, np.broadcast_to(flat_ref, (N, flat_ref.size))], axis=-1)

    assert out.shape == ref_out.shape, (out.shape, ref_out.shape)
    np.testing.assert_allclose(np.asarray(out, dtype=np.float64), ref_out,
                               rtol=1e-4, atol=1e-5)

    print("KERNEL_OK")
</pallas_src>

<mosaic_0001>
module attributes {stable_mosaic.version = 11 : i64} {
  func.func @_dwt_cascade_kernel(%arg0: i32, %arg1: memref<8x384xf32, #tpu.memory_space<vmem>>, %arg2: memref<384x256xf32, #tpu.memory_space<vmem>>, %arg3: memref<8x128xf32, #tpu.memory_space<vmem>>, %arg4: memref<8x384xf32, #tpu.memory_space<vmem>>, %arg5: memref<8x384xf32, #tpu.memory_space<vmem>>) attributes {dimension_semantics = [#tpu.dimension_semantics<arbitrary>], iteration_bounds = array<i64: 1>, scalar_prefetch = 0 : i64, scratch_operands = 2 : i64, tpu.core_type = #tpu.core_type<tc>, window_params = [{pipeline_mode = #tpu.pipeline_mode<synchronous>, transform_indices = @transform_0, window_bounds = array<i64: 8, 384>}, {pipeline_mode = #tpu.pipeline_mode<synchronous>, transform_indices = @transform_1, window_bounds = array<i64: 384, 256>}, {pipeline_mode = #tpu.pipeline_mode<synchronous>, transform_indices = @transform_2, window_bounds = array<i64: 8, 128>}]} {
    %cst = arith.constant 0.000000e+00 : f32
    %0 = vector.broadcast %cst : f32 to vector<8x384xf32>
    %c0 = arith.constant 0 : index
    %c0_0 = arith.constant 0 : index
    %1 = vector.load %arg4[%c0, %c0_0] : memref<8x384xf32, #tpu.memory_space<vmem>>, vector<8x384xf32>
    tpu.vector_store %arg4[%c0, %c0_0], %0 {strides = array<i32>} : memref<8x384xf32, #tpu.memory_space<vmem>>, vector<8x384xf32>,
    %cst_1 = arith.constant 0.000000e+00 : f32
    %2 = vector.broadcast %cst_1 : f32 to vector<8x384xf32>
    %c0_2 = arith.constant 0 : index
    %c0_3 = arith.constant 0 : index
    %3 = vector.load %arg5[%c0_2, %c0_3] : memref<8x384xf32, #tpu.memory_space<vmem>>, vector<8x384xf32>
    tpu.vector_store %arg5[%c0_2, %c0_3], %2 {strides = array<i32>} : memref<8x384xf32, #tpu.memory_space<vmem>>, vector<8x384xf32>,
    %c0_4 = arith.constant 0 : index
    %c0_5 = arith.constant 0 : index
    %4 = vector.load %arg2[%c0_4, %c0_5] : memref<384x256xf32, #tpu.memory_space<vmem>>, vector<384x256xf32>
    %c0_6 = arith.constant 0 : index
    %c0_7 = arith.constant 0 : index
    %5 = vector.load %arg1[%c0_6, %c0_7] : memref<8x384xf32, #tpu.memory_space<vmem>>, vector<8x384xf32>
    %cst_8 = arith.constant dense<0.000000e+00> : vector<8x256xf32>
    %6 = tpu.matmul %5, %4, %cst_8 {dimension_numbers = #tpu.dot_dimension_numbers<[1], [0], [0], [1], [0, 0, 1, 1], [], []>} : vector<8x384xf32>, vector<384x256xf32>, vector<8x256xf32> -> vector<8x256xf32>
    %7 = vector.extract_strided_slice %6 {offsets = [0, 0], sizes = [8, 12], strides = [1, 1]} : vector<8x256xf32> to vector<8x12xf32>
    %c0_9 = arith.constant 0 : index
    %c128 = arith.constant 128 : index
    %8 = vector.load %arg4[%c0_9, %c128] : memref<8x384xf32, #tpu.memory_space<vmem>>, vector<8x12xf32>
    tpu.vector_store %arg4[%c0_9, %c128], %7 {strides = array<i32>} : memref<8x384xf32, #tpu.memory_space<vmem>>, vector<8x12xf32>,
    %9 = vector.extract_strided_slice %6 {offsets = [0, 128], sizes = [8, 12], strides = [1, 1]} : vector<8x256xf32> to vector<8x12xf32>
    %c0_10 = arith.constant 0 : index
    %c28 = arith.constant 28 : index
    %10 = vector.load %arg3[%c0_10, %c28] : memref<8x128xf32, #tpu.memory_space<vmem>>, vector<8x12xf32>
    tpu.vector_store %arg3[%c0_10, %c28], %9 {strides = array<i32>} : memref<8x128xf32, #tpu.memory_space<vmem>>, vector<8x12xf32>,
    %c0_11 = arith.constant 0 : index
    %c128_12 = arith.constant 128 : index
    %11 = vector.load %arg4[%c0_11, %c128_12] : memref<8x384xf32, #tpu.memory_space<vmem>>, vector<8x1xf32>
    %c0_13 = arith.constant 0 : index
    %c127 = arith.constant 127 : index
    %12 = vector.load %arg4[%c0_13, %c127] : memref<8x384xf32, #tpu.memory_space<vmem>>, vector<8x1xf32>
    tpu.vector_store %arg4[%c0_13, %c127], %11 {strides = array<i32>} : memref<8x384xf32, #tpu.memory_space<vmem>>, vector<8x1xf32>,
    %c0_14 = arith.constant 0 : index
    %c139 = arith.constant 139 : index
    %13 = vector.load %arg4[%c0_14, %c139] : memref<8x384xf32, #tpu.memory_space<vmem>>, vector<8x1xf32>
    %c0_15 = arith.constant 0 : index
    %c140 = arith.constant 140 : index
    %14 = vector.load %arg4[%c0_15, %c140] : memref<8x384xf32, #tpu.memory_space<vmem>>, vector<8x1xf32>
    tpu.vector_store %arg4[%c0_15, %c140], %13 {strides = array<i32>} : memref<8x384xf32, #tpu.memory_space<vmem>>, vector<8x1xf32>,
    %c0_16 = arith.constant 0 : index
    %c129 = arith.constant 129 : index
    %15 = vector.load %arg4[%c0_16, %c129] : memref<8x384xf32, #tpu.memory_space<vmem>>, vector<8x1xf32>
    %c0_17 = arith.constant 0 : index
    %c126 = arith.constant 126 : index
    %16 = vector.load %arg4[%c0_17, %c126] : memref<8x384xf32, #tpu.memory_space<vmem>>, vector<8x1xf32>
    tpu.vector_store %arg4[%c0_17, %c126], %15 {strides = array<i32>} : memref<8x384xf32, #tpu.memory_space<vmem>>, vector<8x1xf32>,
    %c0_18 = arith.constant 0 : index
    %c138 = arith.constant 138 : index
    %17 = vector.load %arg4[%c0_18, %c138] : memref<8x384xf32, #tpu.memory_space<vmem>>, vector<8x1xf32>
    %c0_19 = arith.constant 0 : index
    %c141 = arith.constant 141 : index
    %18 = vector.load %arg4[%c0_19, %c141] : memref<8x384xf32, #tpu.memory_space<vmem>>, vector<8x1xf32>
    tpu.vector_store %arg4[%c0_19, %c141], %17 {strides = array<i32>} : memref<8x384xf32, #tpu.memory_space<vmem>>, vector<8x1xf32>,
    %c0_20 = arith.constant 0 : index
    %c130 = arith.constant 130 : index
    %19 = vector.load %arg4[%c0_20, %c130] : memref<8x384xf32, #tpu.memory_space<vmem>>, vector<8x1xf32>
    %c0_21 = arith.constant 0 : index
    %c125 = arith.constant 125 : index
    %20 = vector.load %arg4[%c0_21, %c125] : memref<8x384xf32, #tpu.memory_space<vmem>>, vector<8x1xf32>
    tpu.vector_store %arg4[%c0_21, %c125], %19 {strides = array<i32>} : memref<8x384xf32, #tpu.memory_space<vmem>>, vector<8x1xf32>,
    %c0_22 = arith.constant 0 : index
    %c137 = arith.constant 137 : index
    %21 = vector.load %arg4[%c0_22, %c137] : memref<8x384xf32, #tpu.memory_space<vmem>>, vector<8x1xf32>
    %c0_23 = arith.constant 0 : index
    %c142 = arith.constant 142 : index
    %22 = vector.load %arg4[%c0_23, %c142] : memref<8x384xf32, #tpu.memory_space<vmem>>, vector<8x1xf32>
    tpu.vector_store %arg4[%c0_23, %c142], %21 {strides = array<i32>} : memref<8x384xf32, #tpu.memory_space<vmem>>, vector<8x1xf32>,
    %c0_24 = arith.constant 0 : index
    %c131 = arith.constant 131 : index
    %23 = vector.load %arg4[%c0_24, %c131] : memref<8x384xf32, #tpu.memory_space<vmem>>, vector<8x1xf32>
    %c0_25 = arith.constant 0 : index
    %c124 = arith.constant 124 : index
    %24 = vector.load %arg4[%c0_25, %c124] : memref<8x384xf32, #tpu.memory_space<vmem>>, vector<8x1xf32>
    tpu.vector_store %arg4[%c0_25, %c124], %23 {strides = array<i32>} : memref<8x384xf32, #tpu.memory_space<vmem>>, vector<8x1xf32>,
    %c0_26 = arith.constant 0 : index
    %c136 = arith.constant 136 : index
    %25 = vector.load %arg4[%c0_26, %c136] : memref<8x384xf32, #tpu.memory_space<vmem>>, vector<8x1xf32>
    %c0_27 = arith.constant 0 : index
    %c143 = arith.constant 143 : index
    %26 = vector.load %arg4[%c0_27, %c143] : memref<8x384xf32, #tpu.memory_space<vmem>>, vector<8x1xf32>
    tpu.vector_store %arg4[%c0_27, %c143], %25 {strides = array<i32>} : memref<8x384xf32, #tpu.memory_space<vmem>>, vector<8x1xf32>,
    %c0_28 = arith.constant 0 : index
    %c132 = arith.constant 132 : index
    %27 = vector.load %arg4[%c0_28, %c132] : memref<8x384xf32, #tpu.memory_space<vmem>>, vector<8x1xf32>
    %c0_29 = arith.constant 0 : index
    %c123 = arith.constant 123 : index
    %28 = vector.load %arg4[%c0_29, %c123] : memref<8x384xf32, #tpu.memory_space<vmem>>, vector<8x1xf32>
    tpu.vector_store %arg4[%c0_29, %c123], %27 {strides = array<i32>} : memref<8x384xf32, #tpu.memory_space<vmem>>, vector<8x1xf32>,
    %c0_30 = arith.constant 0 : index
    %c135 = arith.constant 135 : index
    %29 = vector.load %arg4[%c0_30, %c135] : memref<8x384xf32, #tpu.memory_space<vmem>>, vector<8x1xf32>
    %c0_31 = arith.constant 0 : index
    %c144 = arith.constant 144 : index
    %30 = vector.load %arg4[%c0_31, %c144] : memref<8x384xf32, #tpu.memory_space<vmem>>, vector<8x1xf32>
    tpu.vector_store %arg4[%c0_31, %c144], %29 {strides = array<i32>} : memref<8x384xf32, #tpu.memory_space<vmem>>, vector<8x1xf32>,
    %c0_32 = arith.constant 0 : index
    %c133 = arith.constant 133 : index
    %31 = vector.load %arg4[%c0_32, %c133] : memref<8x384xf32, #tpu.memory_space<vmem>>, vector<8x1xf32>
    %c0_33 = arith.constant 0 : index
    %c122 = arith.constant 122 : index
    %32 = vector.load %arg4[%c0_33, %c122] : memref<8x384xf32, #tpu.memory_space<vmem>>, vector<8x1xf32>
    tpu.vector_store %arg4[%c0_33, %c122], %31 {strides = array<i32>} : memref<8x384xf32, #tpu.memory_space<vmem>>, vector<8x1xf32>,
    %c0_34 = arith.constant 0 : index
    %c134 = arith.constant 134 : index
    %33 = vector.load %arg4[%c0_34, %c134] : memref<8x384xf32, #tpu.memory_space<vmem>>, vector<8x1xf32>
    %c0_35 = arith.constant 0 : index
    %c145 = arith.constant 145 : index
    %34 = vector.load %arg4[%c0_35, %c145] : memref<8x384xf32, #tpu.memory_space<vmem>>, vector<8x1xf32>
    tpu.vector_store %arg4[%c0_35, %c145], %33 {strides = array<i32>} : memref<8x384xf32, #tpu.memory_space<vmem>>, vector<8x1xf32>,
    %c0_36 = arith.constant 0 : index
    %c134_37 = arith.constant 134 : index
    %35 = vector.load %arg4[%c0_36, %c134_37] : memref<8x384xf32, #tpu.memory_space<vmem>>, vector<8x1xf32>
    %c0_38 = arith.constant 0 : index
    %c121 = arith.constant 121 : index
    %36 = vector.load %arg4[%c0_38, %c121] : memref<8x384xf32, #tpu.memory_space<vmem>>, vector<8x1xf32>
    tpu.vector_store %arg4[%c0_38, %c121], %35 {strides = array<i32>} : memref<8x384xf32, #tpu.memory_space<vmem>>, vector<8x1xf32>,
    %c0_39 = arith.constant 0 : index
    %c133_40 = arith.constant 133 : index
    %37 = vector.load %arg4[%c0_39, %c133_40] : memref<8x384xf32, #tpu.memory_space<vmem>>, vector<8x1xf32>
    %c0_41 = arith.constant 0 : index
    %c146 = arith.constant 146 : index
    %38 = vector.load %arg4[%c0_41, %c146] : memref<8x384xf32, #tpu.memory_space<vmem>>, vector<8x1xf32>
    tpu.vector_store %arg4[%c0_41, %c146], %37 {strides = array<i32>} : memref<8x384xf32, #tpu.memory_space<vmem>>, vector<8x1xf32>,
    %c0_42 = arith.constant 0 : index
    %c135_43 = arith.constant 135 : index
    %39 = vector.load %arg4[%c0_42, %c135_43] : memref<8x384xf32, #tpu.memory_space<vmem>>, vector<8x1xf32>
    %c0_44 = arith.constant 0 : index
    %c120 = arith.constant 120 : index
    %40 = vector.load %arg4[%c0_44, %c120] : memref<8x384xf32, #tpu.memory_space<vmem>>, vector<8x1xf32>
    tpu.vector_store %arg4[%c0_44, %c120], %39 {strides = array<i32>} : memref<8x384xf32, #tpu.memory_space<vmem>>, vector<8x1xf32>,
    %c0_45 = arith.constant 0 : index
    %c132_46 = arith.constant 132 : index
    %41 = vector.load %arg4[%c0_45, %c132_46] : memref<8x384xf32, #tpu.memory_space<vmem>>, vector<8x1xf32>
    %c0_47 = arith.constant 0 : index
    %c147 = arith.constant 147 : index
    %42 = vector.load %arg4[%c0_47, %c147] : memref<8x384xf32, #tpu.memory_space<vmem>>, vector<8x1xf32>
    tpu.vector_store %arg4[%c0_47, %c147], %41 {strides = array<i32>} : memref<8x384xf32, #tpu.memory_space<vmem>>, vector<8x1xf32>,
    %c0_48 = arith.constant 0 : index
    %c136_49 = arith.constant 136 : index
    %43 = vector.load %arg4[%c0_48, %c136_49] : memref<8x384xf32, #tpu.memory_space<vmem>>, vector<8x1xf32>
    %c0_50 = arith.constant 0 : index
    %c119 = arith.constant 119 : index
    %44 = vector.load %arg4[%c0_50, %c119] : memref<8x384xf32, #tpu.memory_space<vmem>>, vector<8x1xf32>
    tpu.vector_store %arg4[%c0_50, %c119], %43 {strides = array<i32>} : memref<8x384xf32, #tpu.memory_space<vmem>>, vector<8x1xf32>,
    %c0_51 = arith.constant 0 : index
    %c131_52 = arith.constant 131 : index
    %45 = vector.load %arg4[%c0_51, %c131_52] : memref<8x384xf32, #tpu.memory_space<vmem>>, vector<8x1xf32>
    %c0_53 = arith.constant 0 : index
    %c148 = arith.constant 148 : index
    %46 = vector.load %arg4[%c0_53, %c148] : memref<8x384xf32, #tpu.memory_space<vmem>>, vector<8x1xf32>
    tpu.vector_store %arg4[%c0_53, %c148], %45 {strides = array<i32>} : memref<8x384xf32, #tpu.memory_space<vmem>>, vector<8x1xf32>,
    %c0_54 = arith.constant 0 : index
    %c0_55 = arith.constant 0 : index
    %47 = vector.load %arg4[%c0_54, %c0_55] : memref<8x384xf32, #tpu.memory_space<vmem>>, vector<8x384xf32>
    %cst_56 = arith.constant dense<0.000000e+00> : vector<8x256xf32>
    %48 = tpu.matmul %47, %4, %cst_56 {dimension_numbers = #tpu.dot_dimension_numbers<[1], [0], [0], [1], [0, 0, 1, 1], [], []>} : vector<8x384xf32>, vector<384x256xf32>, vector<8x256xf32> -> vector<8x256xf32>
    %49 = vector.extract_strided_slice %48 {offsets = [0, 0], sizes = [8, 10], strides = [1, 1]} : vector<8x256xf32> to vector<8x10xf32>
    %c0_57 = arith.constant 0 : index
    %c128_58 = arith.constant 128 : index
    %50 = vector.load %arg5[%c0_57, %c128_58] : memref<8x384xf32, #tpu.memory_space<vmem>>, vector<8x10xf32>
    tpu.vector_store %arg5[%c0_57, %c128_58], %49 {strides = array<i32>} : memref<8x384xf32, #tpu.memory_space<vmem>>, vector<8x10xf32>,
    %51 = vector.extract_strided_slice %48 {offsets = [0, 128], sizes = [8, 10], strides = [1, 1]} : vector<8x256xf32> to vector<8x10xf32>
    %c0_59 = arith.constant 0 : index
    %c18 = arith.constant 18 : index
    %52 = vector.load %arg3[%c0_59, %c18] : memref<8x128xf32, #tpu.memory_space<vmem>>, vector<8x10xf32>
    tpu.vector_store %arg3[%c0_59, %c18], %51 {strides = array<i32>} : memref<8x128xf32, #tpu.memory_space<vmem>>, vector<8x10xf32>,
    %c0_60 = arith.constant 0 : index
    %c128_61 = arith.constant 128 : index
    %53 = vector.load %arg5[%c0_60, %c128_61] : memref<8x384xf32, #tpu.memory_space<vmem>>, vector<8x1xf32>
    %c0_62 = arith.constant 0 : index
    %c127_63 = arith.constant 127 : index
    %54 = vector.load %arg5[%c0_62, %c127_63] : memref<8x384xf32, #tpu.memory_space<vmem>>, vector<8x1xf32>
    tpu.vector_store %arg5[%c0_62, %c127_63], %53 {strides = array<i32>} : memref<8x384xf32, #tpu.memory_space<vmem>>, vector<8x1xf32>,
    %c0_64 = arith.constant 0 : index
    %c137_65 = arith.constant 137 : index
    %55 = vector.load %arg5[%c0_64, %c137_65] : memref<8x384xf32, #tpu.memory_space<vmem>>, vector<8x1xf32>
    %c0_66 = arith.constant 0 : index
    %c138_67 = arith.constant 138 : index
    %56 = vector.load %arg5[%c0_66, %c138_67] : memref<8x384xf32, #tpu.memory_space<vmem>>, vector<8x1xf32>
    tpu.vector_store %arg5[%c0_66, %c138_67], %55 {strides = array<i32>} : memref<8x384xf32, #tpu.memory_space<vmem>>, vector<8x1xf32>,
    %c0_68 = arith.constant 0 : index
    %c129_69 = arith.constant 129 : index
    %57 = vector.load %arg5[%c0_68, %c129_69] : memref<8x384xf32, #tpu.memory_space<vmem>>, vector<8x1xf32>
    %c0_70 = arith.constant 0 : index
    %c126_71 = arith.constant 126 : index
    %58 = vector.load %arg5[%c0_70, %c126_71] : memref<8x384xf32, #tpu.memory_space<vmem>>, vector<8x1xf32>
    tpu.vector_store %arg5[%c0_70, %c126_71], %57 {strides = array<i32>} : memref<8x384xf32, #tpu.memory_space<vmem>>, vector<8x1xf32>,
    %c0_72 = arith.constant 0 : index
    %c136_73 = arith.constant 136 : index
    %59 = vector.load %arg5[%c0_72, %c136_73] : memref<8x384xf32, #tpu.memory_space<vmem>>, vector<8x1xf32>
    %c0_74 = arith.constant 0 : index
    %c139_75 = arith.constant 139 : index
    %60 = vector.load %arg5[%c0_74, %c139_75] : memref<8x384xf32, #tpu.memory_space<vmem>>, vector<8x1xf32>
    tpu.vector_store %arg5[%c0_74, %c139_75], %59 {strides = array<i32>} : memref<8x384xf32, #tpu.memory_space<vmem>>, vector<8x1xf32>,
    %c0_76 = arith.constant 0 : index
    %c130_77 = arith.constant 130 : index
    %61 = vector.load %arg5[%c0_76, %c130_77] : memref<8x384xf32, #tpu.memory_space<vmem>>, vector<8x1xf32>
    %c0_78 = arith.constant 0 : index
    %c125_79 = arith.constant 125 : index
    %62 = vector.load %arg5[%c0_78, %c125_79] : memref<8x384xf32, #tpu.memory_space<vmem>>, vector<8x1xf32>
    tpu.vector_store %arg5[%c0_78, %c125_79], %61 {strides = array<i32>} : memref<8x384xf32, #tpu.memory_space<vmem>>, vector<8x1xf32>,
    %c0_80 = arith.constant 0 : index
    %c135_81 = arith.constant 135 : index
    %63 = vector.load %arg5[%c0_80, %c135_81] : memref<8x384xf32, #tpu.memory_space<vmem>>, vector<8x1xf32>
    %c0_82 = arith.constant 0 : index
    %c140_83 = arith.constant 140 : index
    %64 = vector.load %arg5[%c0_82, %c140_83] : memref<8x384xf32, #tpu.memory_space<vmem>>, vector<8x1xf32>
    tpu.vector_store %arg5[%c0_82, %c140_83], %63 {strides = array<i32>} : memref<8x384xf32, #tpu.memory_space<vmem>>, vector<8x1xf32>,
    %c0_84 = arith.constant 0 : index
    %c131_85 = arith.constant 131 : index
    %65 = vector.load %arg5[%c0_84, %c131_85] : memref<8x384xf32, #tpu.memory_space<vmem>>, vector<8x1xf32>
    %c0_86 = arith.constant 0 : index
    %c124_87 = arith.constant 124 : index
    %66 = vector.load %arg5[%c0_86, %c124_87] : memref<8x384xf32, #tpu.memory_space<vmem>>, vector<8x1xf32>
    tpu.vector_store %arg5[%c0_86, %c124_87], %65 {strides = array<i32>} : memref<8x384xf32, #tpu.memory_space<vmem>>, vector<8x1xf32>,
    %c0_88 = arith.constant 0 : index
    %c134_89 = arith.constant 134 : index
    %67 = vector.load %arg5[%c0_88, %c134_89] : memref<8x384xf32, #tpu.memory_space<vmem>>, vector<8x1xf32>
    %c0_90 = arith.constant 0 : index
    %c141_91 = arith.constant 141 : index
    %68 = vector.load %arg5[%c0_90, %c141_91] : memref<8x384xf32, #tpu.memory_space<vmem>>, vector<8x1xf32>
    tpu.vector_store %arg5[%c0_90, %c141_91], %67 {strides = array<i32>} : memref<8x384xf32, #tpu.memory_space<vmem>>, vector<8x1xf32>,
    %c0_92 = arith.constant 0 : index
    %c132_93 = arith.constant 132 : index
    %69 = vector.load %arg5[%c0_92, %c132_93] : memref<8x384xf32, #tpu.memory_space<vmem>>, vector<8x1xf32>
    %c0_94 = arith.constant 0 : index
    %c123_95 = arith.constant 123 : index
    %70 = vector.load %arg5[%c0_94, %c123_95] : memref<8x384xf32, #tpu.memory_space<vmem>>, vector<8x1xf32>
    tpu.vector_store %arg5[%c0_94, %c123_95], %69 {strides = array<i32>} : memref<8x384xf32, #tpu.memory_space<vmem>>, vector<8x1xf32>,
    %c0_96 = arith.constant 0 : index
    %c133_97 = arith.constant 133 : index
    %71 = vector.load %arg5[%c0_96, %c133_97] : memref<8x384xf32, #tpu.memory_space<vmem>>, vector<8x1xf32>
    %c0_98 = arith.constant 0 : index
    %c142_99 = arith.constant 142 : index
    %72 = vector.load %arg5[%c0_98, %c142_99] : memref<8x384xf32, #tpu.memory_space<vmem>>, vector<8x1xf32>
    tpu.vector_store %arg5[%c0_98, %c142_99], %71 {strides = array<i32>} : memref<8x384xf32, #tpu.memory_space<vmem>>, vector<8x1xf32>,
    %c0_100 = arith.constant 0 : index
    %c133_101 = arith.constant 133 : index
    %73 = vector.load %arg5[%c0_100, %c133_101] : memref<8x384xf32, #tpu.memory_space<vmem>>, vector<8x1xf32>
    %c0_102 = arith.constant 0 : index
    %c122_103 = arith.constant 122 : index
    %74 = vector.load %arg5[%c0_102, %c122_103] : memref<8x384xf32, #tpu.memory_space<vmem>>, vector<8x1xf32>
    tpu.vector_store %arg5[%c0_102, %c122_103], %73 {strides = array<i32>} : memref<8x384xf32, #tpu.memory_space<vmem>>, vector<8x1xf32>,
    %c0_104 = arith.constant 0 : index
    %c132_105 = arith.constant 132 : index
    %75 = vector.load %arg5[%c0_104, %c132_105] : memref<8x384xf32, #tpu.memory_space<vmem>>, vector<8x1xf32>
    %c0_106 = arith.constant 0 : index
    %c143_107 = arith.constant 143 : index
    %76 = vector.load %arg5[%c0_106, %c143_107] : memref<8x384xf32, #tpu.memory_space<vmem>>, vector<8x1xf32>
    tpu.vector_store %arg5[%c0_106, %c143_107], %75 {strides = array<i32>} : memref<8x384xf32, #tpu.memory_space<vmem>>, vector<8x1xf32>,
    %c0_108 = arith.constant 0 : index
    %c134_109 = arith.constant 134 : index
    %77 = vector.load %arg5[%c0_108, %c134_109] : memref<8x384xf32, #tpu.memory_space<vmem>>, vector<8x1xf32>
    %c0_110 = arith.constant 0 : index
    %c121_111 = arith.constant 121 : index
    %78 = vector.load %arg5[%c0_110, %c121_111] : memref<8x384xf32, #tpu.memory_space<vmem>>, vector<8x1xf32>
    tpu.vector_store %arg5[%c0_110, %c121_111], %77 {strides = array<i32>} : memref<8x384xf32, #tpu.memory_space<vmem>>, vector<8x1xf32>,
    %c0_112 = arith.constant 0 : index
    %c131_113 = arith.constant 131 : index
    %79 = vector.load %arg5[%c0_112, %c131_113] : memref<8x384xf32, #tpu.memory_space<vmem>>, vector<8x1xf32>
    %c0_114 = arith.constant 0 : index
    %c144_115 = arith.constant 144 : index
    %80 = vector.load %arg5[%c0_114, %c144_115] : memref<8x384xf32, #tpu.memory_space<vmem>>, vector<8x1xf32>
    tpu.vector_store %arg5[%c0_114, %c144_115], %79 {strides = array<i32>} : memref<8x384xf32, #tpu.memory_space<vmem>>, vector<8x1xf32>,
    %c0_116 = arith.constant 0 : index
    %c135_117 = arith.constant 135 : index
    %81 = vector.load %arg5[%c0_116, %c135_117] : memref<8x384xf32, #tpu.memory_space<vmem>>, vector<8x1xf32>
    %c0_118 = arith.constant 0 : index
    %c120_119 = arith.constant 120 : index
    %82 = vector.load %arg5[%c0_118, %c120_119] : memref<8x384xf32, #tpu.memory_space<vmem>>, vector<8x1xf32>
    tpu.vector_store %arg5[%c0_118, %c120_119], %81 {strides = array<i32>} : memref<8x384xf32, #tpu.memory_space<vmem>>, vector<8x1xf32>,
    %c0_120 = arith.constant 0 : index
    %c130_121 = arith.constant 130 : index
    %83 = vector.load %arg5[%c0_120, %c130_121] : memref<8x384xf32, #tpu.memory_space<vmem>>, vector<8x1xf32>
    %c0_122 = arith.constant 0 : index
    %c145_123 = arith.constant 145 : index
    %84 = vector.load %arg5[%c0_122, %c145_123] : memref<8x384xf32, #tpu.memory_space<vmem>>, vector<8x1xf32>
    tpu.vector_store %arg5[%c0_122, %c145_123], %83 {strides = array<i32>} : memref<8x384xf32, #tpu.memory_space<vmem>>, vector<8x1xf32>,
    %c0_124 = arith.constant 0 : index
    %c136_125 = arith.constant 136 : index
    %85 = vector.load %arg5[%c0_124, %c136_125] : memref<8x384xf32, #tpu.memory_space<vmem>>, vector<8x1xf32>
    %c0_126 = arith.constant 0 : index
    %c119_127 = arith.constant 119 : index
    %86 = vector.load %arg5[%c0_126, %c119_127] : memref<8x384xf32, #tpu.memory_space<vmem>>, vector<8x1xf32>
    tpu.vector_store %arg5[%c0_126, %c119_127], %85 {strides = array<i32>} : memref<8x384xf32, #tpu.memory_space<vmem>>, vector<8x1xf32>,
    %c0_128 = arith.constant 0 : index
    %c129_129 = arith.constant 129 : index
    %87 = vector.load %arg5[%c0_128, %c129_129] : memref<8x384xf32, #tpu.memory_space<vmem>>, vector<8x1xf32>
    %c0_130 = arith.constant 0 : index
    %c146_131 = arith.constant 146 : index
    %88 = vector.load %arg5[%c0_130, %c146_131] : memref<8x384xf32, #tpu.memory_space<vmem>>, vector<8x1xf32>
    tpu.vector_store %arg5[%c0_130, %c146_131], %87 {strides = array<i32>} : memref<8x384xf32, #tpu.memory_space<vmem>>, vector<8x1xf32>,
    %c0_132 = arith.constant 0 : index
    %c0_133 = arith.constant 0 : index
    %89 = vector.load %arg5[%c0_132, %c0_133] : memref<8x384xf32, #tpu.memory_space<vmem>>, vector<8x384xf32>
    %cst_134 = arith.constant dense<0.000000e+00> : vector<8x256xf32>
    %90 = tpu.matmul %89, %4, %cst_134 {dimension_numbers = #tpu.dot_dimension_numbers<[1], [0], [0], [1], [0, 0, 1, 1], [], []>} : vector<8x384xf32>, vector<384x256xf32>, vector<8x256xf32> -> vector<8x256xf32>
    %91 = vector.extract_strided_slice %90 {offsets = [0, 0], sizes = [8, 9], strides = [1, 1]} : vector<8x256xf32> to vector<8x9xf32>
    %c0_135 = arith.constant 0 : index
    %c0_136 = arith.constant 0 : index
    %92 = vector.load %arg3[%c0_135, %c0_136] : memref<8x128xf32, #tpu.memory_space<vmem>>, vector<8x9xf32>
    tpu.vector_store %arg3[%c0_135, %c0_136], %91 {strides = array<i32>} : memref<8x128xf32, #tpu.memory_space<vmem>>, vector<8x9xf32>,
    %93 = vector.extract_strided_slice %90 {offsets = [0, 128], sizes = [8, 9], strides = [1, 1]} : vector<8x256xf32> to vector<8x9xf32>
    %c0_137 = arith.constant 0 : index
    %c9 = arith.constant 9 : index
    %94 = vector.load %arg3[%c0_137, %c9] : memref<8x128xf32, #tpu.memory_space<vmem>>, vector<8x9xf32>
    tpu.vector_store %arg3[%c0_137, %c9], %93 {strides = array<i32>} : memref<8x128xf32, #tpu.memory_space<vmem>>, vector<8x9xf32>,
    return
  }
  func.func @transform_0(%arg0: i32) -> (i32, i32) {
    %c0_i32 = arith.constant 0 : i32
    %c0_i32_0 = arith.constant 0 : i32
    %c0_i32_1 = arith.constant 0 : i32
    return %c0_i32, %c0_i32_0 : i32, i32
  }
  func.func @transform_1(%arg0: i32) -> (i32, i32) {
    %c0_i32 = arith.constant 0 : i32
    %c0_i32_0 = arith.constant 0 : i32
    %c0_i32_1 = arith.constant 0 : i32
    return %c0_i32, %c0_i32_0 : i32, i32
  }
  func.func @transform_2(%arg0: i32) -> (i32, i32) {
    %c0_i32 = arith.constant 0 : i32
    %c0_i32_0 = arith.constant 0 : i32
    %c0_i32_1 = arith.constant 0 : i32
    return %c0_i32, %c0_i32_0 : i32, i32
  }
}

module attributes {stable_mosaic.version = 11 : i64} {
  func.func @_epilogue_kernel(%arg0: i32, %arg1: memref<16x4xf32, #tpu.memory_space<vmem>>, %arg2: memref<1x164xf32, #tpu.memory_space<vmem>>, %arg3: memref<16x164xf32, #tpu.memory_space<vmem>>) attributes {dimension_semantics = [#tpu.dimension_semantics<parallel>], iteration_bounds = array<i64: 1>, scalar_prefetch = 0 : i64, scratch_operands = 0 : i64, tpu.core_type = #tpu.core_type<tc>, window_params = [{transform_indices = @transform_0, window_bounds = array<i64: 16, 4>}, {pipeline_mode = #tpu.pipeline_mode<synchronous>, transform_indices = @transform_1, window_bounds = array<i64: 1, 164>}, {transform_indices = @transform_2, window_bounds = array<i64: 16, 164>}]} {
    %c0 = arith.constant 0 : index
    %c0_0 = arith.constant 0 : index
    %0 = vector.load %arg2[%c0, %c0_0] : memref<1x164xf32, #tpu.memory_space<vmem>>, vector<1x164xf32>
    %1 = vector.shape_cast %0 : vector<1x164xf32> to vector<1x164xf32>
    %2 = vector.broadcast %1 : vector<1x164xf32> to vector<16x164xf32>
    %c0_1 = arith.constant 0 : index
    %c0_2 = arith.constant 0 : index
    %3 = vector.load %arg3[%c0_1, %c0_2] : memref<16x164xf32, #tpu.memory_space<vmem>>, vector<16x164xf32>
    tpu.vector_store %arg3[%c0_1, %c0_2], %2 {strides = array<i32>} : memref<16x164xf32, #tpu.memory_space<vmem>>, vector<16x164xf32>,
    %c0_3 = arith.constant 0 : index
    %c0_4 = arith.constant 0 : index
    %4 = vector.load %arg1[%c0_3, %c0_4] : memref<16x4xf32, #tpu.memory_space<vmem>>, vector<16x4xf32>
    %c0_5 = arith.constant 0 : index
    %c0_6 = arith.constant 0 : index
    %5 = vector.load %arg3[%c0_5, %c0_6] : memref<16x164xf32, #tpu.memory_space<vmem>>, vector<16x4xf32>
    tpu.vector_store %arg3[%c0_5, %c0_6], %4 {strides = array<i32>} : memref<16x164xf32, #tpu.memory_space<vmem>>, vector<16x4xf32>,
    return
  }
  func.func @transform_0(%arg0: i32) -> (i32, i32) {
    %c0_i32 = arith.constant 0 : i32
    %c0_i32_0 = arith.constant 0 : i32
    return %arg0, %c0_i32 : i32, i32
  }
  func.func @transform_1(%arg0: i32) -> (i32, i32) {
    %c0_i32 = arith.constant 0 : i32
    %c0_i32_0 = arith.constant 0 : i32
    %c0_i32_1 = arith.constant 0 : i32
    return %c0_i32, %c0_i32_0 : i32, i32
  }
  func.func @transform_2(%arg0: i32) -> (i32, i32) {
    %c0_i32 = arith.constant 0 : i32
    %c0_i32_0 = arith.constant 0 : i32
    return %arg0, %c0_i32 : i32, i32
  }
}

</mosaic_0001>

<bundles_post_ra>
// kernel: positional_encoder_forward.3
= control target key start
LH: loop header
LB: loop body
LE: loop exit
PB: predicated region body
PF: predicated region fallthrough
CT: control target
= control target key end

     0   :  { %s105_s0 = inlined_call_operand.vmem [shape: f32[16,4], index: 0, kind: input, shape index: {}]   ;;  %s106_s1 = inlined_call_operand.vmem [shape: f32[1,164], index: 1, kind: input, shape index: {}]   ;;  %s107_s2 = inlined_call_operand.hbm [shape: f32[16,164], index: 2, kind: output, shape index: {}]  }
   0x1   :  { %v12_v0 = vld [vmem:[%s106_s1] sm:$0x3] }
   0x2   :  { %v14_v1 = vperm.slane %v12_v0, 0  ;;  %v15_v2 = vperm.slane %v12_v0, 1 }
   0x3   :  { %7 = vsyncpa [#allocation3], 0  ;;  %vm19_vm0 = vcmask 293888   ;;  %s75_s11 = smov [#allocation2]   ;;  %s34_s15 = sshll.u32 %s107_s2, 4  ;;  %v23_v3 = vld [vmem:[%s105_s0] sm:$0xff]  ;;  %s35_s15 = int_to_ptr.hbm [resolvable:$true] %s34_s15 }
   0x4   :  { %s32_s12 = sshll.u32 %s75_s11, 4  ;;  %18 = vst [vmem:[#allocation2] sm:$0xff] %v14_v1  ;;  %vm25_vm1 = vcmask 31744   ;;  %v24_v4 = vld [vmem:[%s105_s0 + $0x8] sm:$0xff]  ;;  %s76_s19 = smov 256   ;;  %s33_s12 = int_to_ptr.vmem [resolvable:$true] %s32_s12 }
   0x5   :  { %21 = vst [vmem:[#allocation2 + $0x10] sm:$0xff] %v14_v1  ;;  %s77_s20 = smov 16  }
   0x6   :  { %20 = vst.msk [vmem:[#allocation2 + $0x8] sm:$0xff] %vm19_vm0, %v15_v2 }
   0x7   :  { %22 = vst.msk [vmem:[#allocation2 + $0x18] sm:$0xff] %vm19_vm0, %v15_v2 }
   0x8   :  { %26 = vst.msk [vmem:[#allocation2] sm:$0xff] %vm25_vm1, %v23_v3 }
   0x9   :  { %27 = vst.msk [vmem:[#allocation2 + $0x10] sm:$0xff] %vm25_vm1, %v24_v4 }
   0xa   :  { %40 = dma.vmem_to_hbm [thread:$0]  %s33_s12, 512, %s35_s15, [#allocation3], %s76_s19, %s76_s19, %s77_s20  }
   0xb   :  { %73 = dma.done.wait [#allocation3], 512  }
   0xc   :  { %74 = vsyncadd [#allocation3], 4294966784 }
   0xd   :  { %45 = vsyncpa [#allocation3], 1 }

// kernel: positional_encoder_forward.2
= control target key start
LH: loop header
LB: loop body
LE: loop exit
PB: predicated region body
PF: predicated region fallthrough
CT: control target
= control target key end

     0   :  { %7 = vsyncpa [#allocation5], 0  ;;  %s813_s12 = smov [#allocation4]   ;;  %s814_s14 = smov 256   ;;  %s1445_s0 = inlined_call_operand.vmem [shape: f32[8,384], index: 0, kind: input, shape index: {}]   ;;  %s1446_s1 = inlined_call_operand.hbm [shape: f32[384,256], index: 1, kind: input, shape index: {}]   ;;  %s1447_s2 = inlined_call_operand.vmem [shape: f32[8,128], index: 2, kind: output, shape index: {}]  }
   0x1   :  { %s14_s11 = sshll.u32 %s1446_s1, 4  ;;  %s16_s13 = sshll.u32 %s813_s12, 4  ;;  %s15_s11 = int_to_ptr.hbm [resolvable:$true] %s14_s11  ;;  %s17_s13 = int_to_ptr.vmem [resolvable:$true] %s16_s13 }
   0x2   :  { %s815_s15 = smov 16  }
   0x3   :  { %22 = dma.hbm_to_vmem [thread:$0]  %s15_s11, 12288, %s17_s13, [#allocation5], %s814_s14, %s814_s14, %s815_s15  }
   0x4   :  { %811 = dma.done.wait [#allocation5], 12288  }
   0x5   :  { %812 = vsyncadd [#allocation5], 4294955008  ;;  %v855_v0 = vld [vmem:[#allocation4 + $0x2f0] sm:$0xff]  ;;  %v857_v1 = vld [vmem:[#allocation4 + $0x2e0] sm:$0xff]  ;;  %v1448_v51 = vmov 0.0   ;;  %vm252_vm0 = vcmask 97280  }
   0x6   :  { %v859_v2 = vld [vmem:[#allocation4 + $0xf0] sm:$0xff]  ;;  %172 = vmatpush.msra.mxu2 %v855_v0  ;;  %v865_v4 = vld [vmem:[#allocation4 + $0xe0] sm:$0xff]  ;;  %v1009_v50 = vld [vmem:[%s1445_s0 + $0x8] sm:$0xff]  ;;  %28 = vst [vmem:[#allocation2 + $0x8] sm:$0xff] %v1448_v51  ;;  %vm272_vm1 = vcmask 105568   ;;  %s818_s21 = smov 3  }
   0x7   :  { %1500 = vst [vmem:[#allocation7_spill] sm:$0xff] %v859_v2  ;;  %132 = vmatpush.msra.mxu0 %v859_v2  ;;  %v863_v3 = vld [vmem:[#allocation4 + $0x1f0] sm:$0xff]  ;;  %v870_v6 = vld [vmem:[#allocation4 + $0x1e0] sm:$0xff]  ;;  %vm286_vm2 = vcmask 113768   ;;  %s819_s22 = smov 5   ;;  %vm300_vm3 = vcmask 121968  }
   0x8   :  { %1501 = vst [vmem:[#allocation8_spill] sm:$0xff] %v865_v4  ;;  %152 = vmatpush.msra.mxu1 %v863_v3  ;;  %v868_v5 = vld [vmem:[#allocation4 + $0x2d0] sm:$0xff]  ;;  %173 = vmatpush.msra.mxu2 %v857_v1  ;;  %v879_v9 = vld [vmem:[#allocation4 + $0x2c0] sm:$0xff]  ;;  %s820_s23 = smov 7   ;;  %vm314_vm4 = vcmask 130168   ;;  %s821_s24 = smov 9  }
   0x9   :  { %v872_v7 = vld [vmem:[#allocation4 + $0xd0] sm:$0xff]  ;;  %133 = vmatpush.msra.mxu0 %v865_v4  ;;  %v881_v10 = vld [vmem:[#allocation4 + $0xc0] sm:$0xff]  ;;  %27 = vst [vmem:[#allocation2] sm:$0xff] %v1448_v51  ;;  %vm328_vm5 = vcmask 138368   ;;  %s822_s25 = smov 11   ;;  %s823_s26 = smov 127  }
   0xa   :  { %1502 = vst [vmem:[#allocation9_spill] sm:$0xff] %v872_v7  ;;  %v876_v8 = vld [vmem:[#allocation4 + $0x1d0] sm:$0xff]  ;;  %153 = vmatpush.msra.mxu1 %v870_v6  ;;  %174 = vmatpush.msra.mxu2 %v868_v5  ;;  %v885_v11 = vld [vmem:[#allocation4 + $0x1c0] sm:$0xff]  ;;  %s824_s27 = smov 121   ;;  %vm342_vm6 = vcmask 146568   ;;  %vm265_vm7 = vcmask 1048568  }
   0xb   :  { %1503 = vst [vmem:[#allocation10_spill] sm:$0xff] %v881_v10  ;;  %134 = vmatpush.msra.mxu0 %v872_v7  ;;  %v888_v12 = vld [vmem:[#allocation4 + $0x2b0] sm:$0xff]  ;;  %v897_v15 = vld [vmem:[#allocation4 + $0x2a0] sm:$0xff]  ;;  %s825_s28 = smov 13   ;;  %s826_s29 = smov 115   ;;  %vm1498_vm8 = vcmask 154768  }
   0xc   :  { %154 = vmatpush.msra.mxu1 %v876_v8  ;;  %v890_v13 = vld [vmem:[#allocation4 + $0xb0] sm:$0xff]  ;;  %175 = vmatpush.msra.mxu2 %v879_v9  ;;  %v899_v16 = vld [vmem:[#allocation4 + $0xa0] sm:$0xff]  ;;  %30 = vst [vmem:[#allocation3] sm:$0xff] %v1448_v51  ;;  %s827_s30 = smov 125   ;;  %s828_s3 = smov 119   ;;  %vm279_vm9 = vcmask 1040368  }
   0xd   :  { %1504 = vst [vmem:[#allocation11_spill] sm:$0xff] %v890_v13  ;;  %135 = vmatpush.msra.mxu0 %v881_v10  ;;  %v894_v14 = vld [vmem:[#allocation4 + $0x1b0] sm:$0xff]  ;;  %v903_v17 = vld [vmem:[#allocation4 + $0x1a0] sm:$0xff]  ;;  %s829_s4 = smov 15   ;;  %s830_s5 = smov 113   ;;  %vm370_vm10 = vcmask 162968  }
   0xe   :  { %155 = vmatpush.msra.mxu1 %v885_v11  ;;  %1505 = vst [vmem:[#allocation12_spill] sm:$0xff] %v899_v16  ;;  %176 = vmatpush.msra.mxu2 %v888_v12  ;;  %v906_v18 = vld [vmem:[#allocation4 + $0x290] sm:$0xff]  ;;  %v915_v21 = vld [vmem:[#allocation4 + $0x280] sm:$0xff]  ;;  %s831_s6 = smov 123   ;;  %s832_s7 = smov 117   ;;  %vm293_vm11 = vcmask 1032168  }
   0xf   :  { %136 = vmatpush.msra.mxu0 %v890_v13  ;;  %v908_v19 = vld [vmem:[#allocation4 + $0x90] sm:$0xff]  ;;  %v917_v22 = vld [vmem:[#allocation4 + $0x80] sm:$0xff]  ;;  %31 = vst [vmem:[#allocation3 + $0x8] sm:$0xff] %v1448_v51  ;;  %v1096_v51 = vld [vmem:[#allocation4 + $0x1d8] sm:$0xff]  ;;  %vm307_vm12 = vcmask 1023968   ;;  %vm321_vm13 = vcmask 1015768  }
  0x10   :  { %156 = vmatpush.msra.mxu1 %v894_v14  ;;  %1506 = vst [vmem:[#allocation13_spill] sm:$0xff] %v908_v19  ;;  %177 = vmatpush.msra.mxu2 %v897_v15  ;;  %v912_v20 = vld [vmem:[#allocation4 + $0x190] sm:$0xff]  ;;  %v921_v23 = vld [vmem:[#allocation4 + $0x180] sm:$0xff]  ;;  %s833_s8 = smov 17   ;;  %s834_s9 = smov 111   ;;  %vm335_vm14 = vcmask 1007568  }
  0x11   :  { %137 = vmatpush.msra.mxu0 %v899_v16  ;;  %1507 = vst [vmem:[#allocation14_spill] sm:$0xff] %v917_v22  ;;  %v924_v24 = vld [vmem:[#allocation4 + $0x270] sm:$0xff]  ;;  %v933_v27 = vld [vmem:[#allocation4 + $0x260] sm:$0xff]  ;;  %vm349_vm15 = vcmask 999368   ;;  %s835_s10 = smov 28   ;;  %s836_s13 = smov 18  }
  0x12   :  { %157 = vmatpush.msra.mxu1 %v903_v17  ;;  %178 = vmatpush.msra.mxu2 %v906_v18  ;;  %v926_v25 = vld [vmem:[#allocation4 + $0x70] sm:$0xff]  ;;  %v935_v28 = vld [vmem:[#allocation4 + $0x60] sm:$0xff]  ;;  %1524 = vst [vmem:[#allocation31_spill] sm:$0xff] %v1096_v51 }
  0x13   :  { %138 = vmatpush.msra.mxu0 %v908_v19  ;;  %1508 = vst [vmem:[#allocation15_spill] sm:$0xff] %v926_v25  ;;  %v930_v26 = vld [vmem:[#allocation4 + $0x170] sm:$0xff]  ;;  %v939_v29 = vld [vmem:[#allocation4 + $0x160] sm:$0xff] }
  0x14   :  { %158 = vmatpush.msra.mxu1 %v912_v20  ;;  %179 = vmatpush.msra.mxu2 %v915_v21  ;;  %1509 = vst [vmem:[#allocation16_spill] sm:$0xff] %v935_v28  ;;  %v942_v30 = vld [vmem:[#allocation4 + $0x250] sm:$0xff]  ;;  %v951_v33 = vld [vmem:[#allocation4 + $0x240] sm:$0xff] }
  0x15   :  { %139 = vmatpush.msra.mxu0 %v917_v22  ;;  %1510 = vst [vmem:[#allocation17_spill] sm:$0xff] %v942_v30  ;;  %v944_v31 = vld [vmem:[#allocation4 + $0x50] sm:$0xff]  ;;  %v953_v34 = vld [vmem:[#allocation4 + $0x40] sm:$0xff] }
  0x16   :  { %159 = vmatpush.msra.mxu1 %v921_v23  ;;  %180 = vmatpush.msra.mxu2 %v924_v24  ;;  %1511 = vst [vmem:[#allocation18_spill] sm:$0xff] %v944_v31  ;;  %v948_v32 = vld [vmem:[#allocation4 + $0x150] sm:$0xff]  ;;  %v957_v35 = vld [vmem:[#allocation4 + $0x140] sm:$0xff] }
  0x17   :  { %140 = vmatpush.msra.mxu0 %v926_v25  ;;  %1512 = vst [vmem:[#allocation19_spill] sm:$0xff] %v951_v33  ;;  %v960_v36 = vld [vmem:[#allocation4 + $0x230] sm:$0xff]  ;;  %v969_v39 = vld [vmem:[#allocation4 + $0x220] sm:$0xff] }
  0x18   :  { %160 = vmatpush.msra.mxu1 %v930_v26  ;;  %181 = vmatpush.msra.mxu2 %v933_v27  ;;  %1513 = vst [vmem:[#allocation20_spill] sm:$0xff] %v953_v34  ;;  %v962_v37 = vld [vmem:[#allocation4 + $0x30] sm:$0xff]  ;;  %v971_v40 = vld [vmem:[#allocation4 + $0x20] sm:$0xff] }
  0x19   :  { %141 = vmatpush.msra.mxu0 %v935_v28  ;;  %1514 = vst [vmem:[#allocation21_spill] sm:$0xff] %v960_v36  ;;  %v966_v38 = vld [vmem:[#allocation4 + $0x130] sm:$0xff]  ;;  %v975_v41 = vld [vmem:[#allocation4 + $0x120] sm:$0xff] }
  0x1a   :  { %161 = vmatpush.msra.mxu1 %v939_v29  ;;  %182 = vmatpush.msra.mxu2 %v942_v30  ;;  %1515 = vst [vmem:[#allocation22_spill] sm:$0xff] %v962_v37  ;;  %v978_v42 = vld [vmem:[#allocation4 + $0x210] sm:$0xff]  ;;  %v987_v45 = vld [vmem:[#allocation4 + $0x200] sm:$0xff] }
  0x1b   :  { %142 = vmatpush.msra.mxu0 %v944_v31  ;;  %1516 = vst [vmem:[#allocation23_spill] sm:$0xff] %v969_v39  ;;  %v980_v43 = vld [vmem:[#allocation4 + $0x10] sm:$0xff]  ;;  %v989_v46 = vld [vmem:[#allocation4] sm:$0xff] }
  0x1c   :  { %162 = vmatpush.msra.mxu1 %v948_v32  ;;  %183 = vmatpush.msra.mxu2 %v951_v33  ;;  %1517 = vst [vmem:[#allocation24_spill] sm:$0xff] %v971_v40  ;;  %v984_v44 = vld [vmem:[#allocation4 + $0x110] sm:$0xff]  ;;  %v995_v47 = vld [vmem:[%s1445_s0 + $0x10] sm:$0xff]  ;;  %v1200_v33 = vld [vmem:[#allocation4 + $0x218] sm:$0xff] }
  0x1d   :  { %143 = vmatpush.msra.mxu0 %v953_v34  ;;  %1518 = vst [vmem:[#allocation25_spill] sm:$0xff] %v978_v42  ;;  %v998_v48 = vld [vmem:[#allocation4 + $0x100] sm:$0xff]  ;;  %v1004_v49 = vld [vmem:[%s1445_s0] sm:$0xff]  ;;  %s817_s0 = smov 1  }
  0x1e   :  { %163 = vmatpush.msra.mxu1 %v957_v35  ;;  %184 = vmatpush.msra.mxu2 %v960_v36  ;;  %1519 = vst [vmem:[#allocation26_spill] sm:$0xff] %v980_v43 }
  0x1f   :  { %144 = vmatpush.msra.mxu0 %v962_v37  ;;  %1520 = vst [vmem:[#allocation27_spill] sm:$0xff] %v987_v45 }
  0x20   :  { %164 = vmatpush.msra.mxu1 %v966_v38  ;;  %185 = vmatpush.msra.mxu2 %v969_v39  ;;  %1521 = vst [vmem:[#allocation28_spill] sm:$0xff] %v989_v46  ;;  %v1185_v39 = vld [vmem:[#allocation4 + $0x238] sm:$0xff] }
  0x21   :  { %145 = vmatpush.msra.mxu0 %v971_v40  ;;  %1534 = vst [vmem:[#allocation41_spill] sm:$0xff] %v1200_v33 }
  0x22   :  { %165 = vmatpush.msra.mxu1 %v975_v41  ;;  %186 = vmatpush.msra.mxu2 %v978_v42  ;;  %v1175_v42 = vld [vmem:[#allocation4 + $0x248] sm:$0xff] }
  0x23   :  { %146 = vmatpush.msra.mxu0 %v980_v43 }
  0x24   :  { %166 = vmatpush.msra.mxu1 %v984_v44  ;;  %187 = vmatpush.msra.mxu2 %v987_v45 }
  0x25   :  { %147 = vmatpush.msra.mxu0 %v989_v46  ;;  %188 = vmatmul.f32.vlgmr.msra.gmra.mxu2 %v995_v47 }
  0x26   :  { %167 = vmatpush.msra.mxu1 %v998_v48  ;;  %148 = vmatmul.f32.vlgmr.msra.gmra.mxu0 %v1004_v49 }
  0x27   :  { %168 = vmatmul.f32.vlgmr.msra.gmra.mxu1 %v1009_v50  ;;  %389 = vmatpush.msrb.mxu2 %v859_v2  ;;  %v1165_v2 = vld [vmem:[#allocation4 + $0x258] sm:$0xff] }
  0x29   :  { %390 = vmatpush.msrb.mxu2 %v865_v4 }
  0x2b   :  { %391 = vmatpush.msrb.mxu2 %v872_v7  ;;  %v1157_v7 = vld [vmem:[#allocation4 + $0x178] sm:$0xff] }
  0x2c   :  { %1531 = vst [vmem:[#allocation38_spill] sm:$0xff] %v1157_v7 }
  0x2d   :  { %392 = vmatpush.msrb.mxu2 %v881_v10 }
  0x2f   :  { %393 = vmatpush.msrb.mxu2 %v890_v13  ;;  %v1154_v13 = vld [vmem:[#allocation4 + $0x268] sm:$0xff] }
  0x31   :  { %394 = vmatpush.msrb.mxu2 %v899_v16  ;;  %v1146_v16 = vld [vmem:[#allocation4 + $0x188] sm:$0xff] }
  0x32   :  { %1530 = vst [vmem:[#allocation37_spill] sm:$0xff] %v1146_v16 }
  0x33   :  { %395 = vmatpush.msrb.mxu2 %v908_v19  ;;  %v1140_v19 = vld [vmem:[#allocation4 + $0x278] sm:$0xff] }
  0x34   :  { %1529 = vst [vmem:[#allocation36_spill] sm:$0xff] %v1140_v19 }
  0x35   :  { %396 = vmatpush.msrb.mxu2 %v917_v22  ;;  %v1130_v22 = vld [vmem:[#allocation4 + $0x288] sm:$0xff] }
  0x37   :  { %397 = vmatpush.msrb.mxu2 %v926_v25  ;;  %v1128_v25 = vld [vmem:[#allocation4 + $0x68] sm:$0xff] }
  0x39   :  { %398 = vmatpush.msrb.mxu2 %v935_v28  ;;  %v1120_v28 = vld [vmem:[#allocation4 + $0x298] sm:$0xff] }
  0x3b   :  { %399 = vmatpush.msrb.mxu2 %v944_v31  ;;  %v1118_v31 = vld [vmem:[#allocation4 + $0x78] sm:$0xff] }
  0x3d   :  { %400 = vmatpush.msrb.mxu2 %v953_v34 }
  0x3f   :  { %401 = vmatpush.msrb.mxu2 %v962_v37  ;;  %v1110_v37 = vld [vmem:[#allocation4 + $0x2a8] sm:$0xff] }
  0x41   :  { %402 = vmatpush.msrb.mxu2 %v971_v40  ;;  %v1106_v40 = vld [vmem:[#allocation4 + $0x1c8] sm:$0xff] }
  0x42   :  { %1525 = vst [vmem:[#allocation32_spill] sm:$0xff] %v1106_v40 }
  0x43   :  { %403 = vmatpush.msrb.mxu2 %v980_v43  ;;  %v1100_v43 = vld [vmem:[#allocation4 + $0x2b8] sm:$0xff] }
  0x45   :  { %404 = vmatpush.msrb.mxu2 %v989_v46  ;;  %v1098_v46 = vld [vmem:[#allocation4 + $0x98] sm:$0xff] }
  0xa3   :  { %v149_v52 = vpop.f32.mrf.mxu0 }
  0xa4   :  { %v169_v53 = vpop.f32.mrf.mxu1 }
  0xa5   :  { %v170_v54 = vadd.f32 %v169_v53, %v149_v52 }
  0xa8   :  { %v189_v55 = vpop.f32.mrf.mxu2 }
  0xa9   :  { %v190_v56 = vadd.f32 %v189_v55, %v170_v54 }
  0xab   :  { %253 = vst.msk [vmem:[#allocation2 + $0x8] sm:$0xff] %vm252_vm0, %v190_v56  ;;  %vm1499_vm0 = vcmask 991168  }
  0xb2   :  { %v267_v57 = vld [vmem:[#allocation2 + $0x8] sm:$0xff] }
  0xb3   :  { %269 = vrot.lane.b32.xlu0 %v267_v57, %s817_s0 }
 0x125   :  { %v270_v58 = vpop.permute.xlu0 %269 }
 0x126   :  { %273 = vst.msk [vmem:[#allocation2 + $0x8] sm:$0xff] %vm272_vm1, %v270_v58 }
 0x12d   :  { %v281_v59 = vld [vmem:[#allocation2 + $0x8] sm:$0xff] }
 0x12e   :  { %283 = vrot.lane.b32.xlu0 %v281_v59, %s818_s21 }
 0x1a0   :  { %v284_v60 = vpop.permute.xlu0 %283 }
 0x1a1   :  { %287 = vst.msk [vmem:[#allocation2 + $0x8] sm:$0xff] %vm286_vm2, %v284_v60 }
 0x1a8   :  { %v295_v61 = vld [vmem:[#allocation2 + $0x8] sm:$0xff] }
 0x1a9   :  { %297 = vrot.lane.b32.xlu1 %v295_v61, %s819_s22 }
 0x21b   :  { %v298_v62 = vpop.permute.xlu1 %297 }
 0x21c   :  { %301 = vst.msk [vmem:[#allocation2 + $0x8] sm:$0xff] %vm300_vm3, %v298_v62 }
 0x223   :  { %v309_v63 = vld [vmem:[#allocation2 + $0x8] sm:$0xff] }
 0x224   :  { %311 = vrot.lane.b32.xlu1 %v309_v63, %s820_s23 }
 0x296   :  { %v312_v52 = vpop.permute.xlu1 %311 }
 0x297   :  { %315 = vst.msk [vmem:[#allocation2 + $0x8] sm:$0xff] %vm314_vm4, %v312_v52  ;;  %v1064_v52 = vld [vmem:[#allocation4 + $0xe8] sm:$0xff] }
 0x29e   :  { %v323_v53 = vld [vmem:[#allocation2 + $0x8] sm:$0xff] }
 0x29f   :  { %325 = vrot.lane.b32.xlu2 %v323_v53, %s821_s24 }
 0x2f9   :  { %v326_v54 = vpop.permute.xlu2 %325 }
 0x2fa   :  { %329 = vst.msk [vmem:[#allocation2 + $0x8] sm:$0xff] %vm328_vm5, %v326_v54  ;;  %v1070_v54 = vld [vmem:[#allocation4 + $0xc8] sm:$0xff] }
 0x301   :  { %v337_v55 = vld [vmem:[#allocation2 + $0x8] sm:$0xff] }
 0x302   :  { %339 = vrot.lane.b32.xlu2 %v337_v55, %s822_s25 }
 0x30a   :  { %262 = vrot.lane.b32.xlu2 %v267_v57, %s823_s26 }
 0x312   :  { %304 = vrot.lane.b32.xlu2 %v309_v63, %s824_s27 }
 0x35c   :  { %v340_v56 = vpop.permute.xlu2 %339 }
 0x35d   :  { %343 = vst.msk [vmem:[#allocation2 + $0x8] sm:$0xff] %vm342_vm6, %v340_v56  ;;  %v1072_v56 = vld [vmem:[#allocation4 + $0x2f8] sm:$0xff] }
 0x35e   :  { %232 = vmatpush.msrb.mxu1 %v1072_v56 }
 0x364   :  { %v263_v58 = vpop.permute.xlu2 %262  ;;  %v351_v60 = vld [vmem:[#allocation2 + $0x8] sm:$0xff] }
 0x365   :  { %266 = vst.msk [vmem:[#allocation2] sm:$0xff] %vm265_vm7, %v263_v58  ;;  %353 = vrot.lane.b32.xlu0 %v351_v60, %s825_s28  ;;  %346 = vrot.lane.b32.xlu2 %v351_v60, %s826_s29  ;;  %v1080_v58 = vld [vmem:[#allocation4 + $0x2d8] sm:$0xff] }
 0x366   :  { %v1082_v60 = vld [vmem:[#allocation4 + $0x1f8] sm:$0xff] }
 0x367   :  { %1522 = vst [vmem:[#allocation29_spill] sm:$0xff] %v1082_v60  ;;  %212 = vmatpush.msrb.mxu0 %v1082_v60  ;;  %469 = vmatpush.msra.mxu2 %v1082_v60  ;;  %v1108_v60 = vld [vmem:[#allocation4 + $0x88] sm:$0xff] }
 0x36c   :  { %v305_v4 = vpop.permute.xlu2 %304 }
 0x36d   :  { %276 = vrot.lane.b32.xlu0 %v281_v59, %s827_s30  ;;  %v1062_v59 = vld [vmem:[#allocation4 + $0xf8] sm:$0xff] }
 0x36e   :  { %192 = vmatpush.msra.mxu3 %v1062_v59 }
 0x370   :  { %193 = vmatpush.msra.mxu3 %v1064_v52 }
 0x375   :  { %318 = vrot.lane.b32.xlu0 %v323_v53, %s828_s3  ;;  %v1067_v53 = vld [vmem:[#allocation4 + $0xd8] sm:$0xff] }
 0x376   :  { %194 = vmatpush.msra.mxu3 %v1067_v53 }
 0x378   :  { %195 = vmatpush.msra.mxu3 %v1070_v54 }
 0x3d7   :  { %v354_v57 = vpop.permute.xlu0 %353 }
 0x3d8   :  { %357 = vst.msk [vmem:[#allocation2 + $0x8] sm:$0xff] %vm1498_vm8, %v354_v57  ;;  %v1086_v57 = vld [vmem:[#allocation4 + $0x1e8] sm:$0xff]  ;;  %vm528_vm8 = vcmask 89168  }
 0x3d9   :  { %1523 = vst [vmem:[#allocation30_spill] sm:$0xff] %v1086_v57  ;;  %213 = vmatpush.msrb.mxu0 %v1086_v57  ;;  %470 = vmatpush.msra.mxu2 %v1086_v57  ;;  %v1116_v57 = vld [vmem:[#allocation4 + $0x1b8] sm:$0xff] }
 0x3da   :  { %1526 = vst [vmem:[#allocation33_spill] sm:$0xff] %v1116_v57 }
 0x3db   :  { %214 = vmatpush.msrb.mxu0 %v1096_v51  ;;  %471 = vmatpush.msra.mxu2 %v1096_v51  ;;  %v1126_v51 = vld [vmem:[#allocation4 + $0x1a8] sm:$0xff] }
 0x3dc   :  { %1527 = vst [vmem:[#allocation34_spill] sm:$0xff] %v1126_v51 }
 0x3dd   :  { %215 = vmatpush.msrb.mxu0 %v1106_v40  ;;  %472 = vmatpush.msra.mxu2 %v1106_v40  ;;  %v1136_v40 = vld [vmem:[#allocation4 + $0x198] sm:$0xff] }
 0x3de   :  { %1528 = vst [vmem:[#allocation35_spill] sm:$0xff] %v1136_v40 }
 0x3df   :  { %v277_v62 = vpop.permute.xlu0 %276  ;;  %v365_v63 = vld [vmem:[#allocation2 + $0x8] sm:$0xff]  ;;  %216 = vmatpush.msrb.mxu0 %v1116_v57  ;;  %473 = vmatpush.msra.mxu2 %v1116_v57  ;;  %v1151_v57 = vld [vmem:[#allocation4 + $0x48] sm:$0xff] }
 0x3e0   :  { %280 = vst.msk [vmem:[#allocation2] sm:$0xff] %vm279_vm9, %v277_v62  ;;  %367 = vrot.lane.b32.xlu1 %v365_v63, %s829_s4  ;;  %360 = vrot.lane.b32.xlu0 %v365_v63, %s830_s5  ;;  %v1088_v62 = vld [vmem:[#allocation4 + $0xa8] sm:$0xff] }
 0x3e1   :  { %v1090_v63 = vld [vmem:[#allocation4 + $0x2c8] sm:$0xff]  ;;  %217 = vmatpush.msrb.mxu0 %v1126_v51  ;;  %474 = vmatpush.msra.mxu2 %v1126_v51 }
 0x3e3   :  { %218 = vmatpush.msrb.mxu0 %v1136_v40  ;;  %475 = vmatpush.msra.mxu2 %v1136_v40  ;;  %v1163_v40 = vld [vmem:[#allocation4 + $0x38] sm:$0xff] }
 0x3e5   :  { %219 = vmatpush.msrb.mxu0 %v1146_v16  ;;  %476 = vmatpush.msra.mxu2 %v1146_v16  ;;  %v1170_v16 = vld [vmem:[#allocation4 + $0x168] sm:$0xff] }
 0x3e6   :  { %1532 = vst [vmem:[#allocation39_spill] sm:$0xff] %v1170_v16 }
 0x3e7   :  { %v319_v45 = vpop.permute.xlu0 %318  ;;  %220 = vmatpush.msrb.mxu0 %v1157_v7  ;;  %477 = vmatpush.msra.mxu2 %v1157_v7  ;;  %v1193_v7 = vld [vmem:[#allocation4 + $0x228] sm:$0xff] }
 0x3e8   :  { %290 = vrot.lane.b32.xlu1 %v295_v61, %s831_s6  ;;  %v1076_v61 = vld [vmem:[#allocation4 + $0x2e8] sm:$0xff] }
 0x3e9   :  { %233 = vmatpush.msrb.mxu1 %v1076_v61  ;;  %221 = vmatpush.msrb.mxu0 %v1170_v16 }
 0x3ea   :  { %478 = vmatpush.msra.mxu2 %v1170_v16  ;;  %v347_v16 = vpop.permute.xlu2 %346 }
 0x3eb   :  { %234 = vmatpush.msrb.mxu1 %v1080_v58 }
 0x3ed   :  { %235 = vmatpush.msrb.mxu1 %v1090_v63 }
 0x3ef   :  { %236 = vmatpush.msrb.mxu1 %v1100_v43 }
 0x3f0   :  { %332 = vrot.lane.b32.xlu1 %v337_v55, %s832_s7  ;;  %v1078_v55 = vld [vmem:[#allocation4 + $0xb8] sm:$0xff] }
 0x3f1   :  { %196 = vmatpush.msra.mxu3 %v1078_v55  ;;  %237 = vmatpush.msrb.mxu1 %v1110_v37 }
 0x3f3   :  { %197 = vmatpush.msra.mxu3 %v1088_v62  ;;  %238 = vmatpush.msrb.mxu1 %v1120_v28 }
 0x3f5   :  { %198 = vmatpush.msra.mxu3 %v1098_v46  ;;  %239 = vmatpush.msrb.mxu1 %v1130_v22 }
 0x3f7   :  { %199 = vmatpush.msra.mxu3 %v1108_v60  ;;  %240 = vmatpush.msrb.mxu1 %v1140_v19 }
 0x3f9   :  { %200 = vmatpush.msra.mxu3 %v1118_v31  ;;  %241 = vmatpush.msrb.mxu1 %v1154_v13 }
 0x3fb   :  { %201 = vmatpush.msra.mxu3 %v1128_v25  ;;  %242 = vmatpush.msrb.mxu1 %v1165_v2 }
 0x3fd   :  { %243 = vmatpush.msrb.mxu1 %v1175_v42 }
 0x3ff   :  { %244 = vmatpush.msrb.mxu1 %v1185_v39 }
 0x401   :  { %245 = vmatpush.msrb.mxu1 %v1193_v7 }
 0x403   :  { %246 = vmatpush.msrb.mxu1 %v1200_v33 }
 0x452   :  { %v368_v34 = vpop.permute.xlu1 %367  ;;  %v361_v30 = vpop.permute.xlu0 %360 }
 0x453   :  { %371 = vst.msk [vmem:[#allocation2 + $0x8] sm:$0xff] %vm370_vm10, %v368_v34  ;;  %v1138_v34 = vld [vmem:[#allocation4 + $0x58] sm:$0xff]  ;;  %vm384_vm10 = vcmask 171168  }
 0x454   :  { %202 = vmatpush.msra.mxu3 %v1138_v34 }
 0x456   :  { %203 = vmatpush.msra.mxu3 %v1151_v57 }
 0x458   :  { %204 = vmatpush.msra.mxu3 %v1163_v40 }
 0x45a   :  { %v291_v51 = vpop.permute.xlu1 %290  ;;  %v379_v10 = vld [vmem:[#allocation2 + $0x8] sm:$0xff] }
 0x45b   :  { %294 = vst.msk [vmem:[#allocation2] sm:$0xff] %vm293_vm11, %v291_v51  ;;  %381 = vrot.lane.b32.xlu2 %v379_v10, %s833_s8  ;;  %374 = vrot.lane.b32.xlu1 %v379_v10, %s834_s9  ;;  %v1173_v51 = vld [vmem:[#allocation4 + $0x28] sm:$0xff]  ;;  %v1183_v10 = vld [vmem:[#allocation4 + $0x18] sm:$0xff] }
 0x45c   :  { %308 = vst.msk [vmem:[#allocation2] sm:$0xff] %vm307_vm12, %v305_v4  ;;  %v1181_v4 = vld [vmem:[#allocation4 + $0x158] sm:$0xff]  ;;  %205 = vmatpush.msra.mxu3 %v1173_v51 }
 0x45d   :  { %322 = vst.msk [vmem:[#allocation2] sm:$0xff] %vm321_vm13, %v319_v45  ;;  %v1191_v45 = vld [vmem:[#allocation4 + $0x8] sm:$0xff]  ;;  %222 = vmatpush.msrb.mxu0 %v1181_v4  ;;  %479 = vmatpush.msra.mxu2 %v1181_v4 }
 0x45e   :  { %1533 = vst [vmem:[#allocation40_spill] sm:$0xff] %v1181_v4  ;;  %206 = vmatpush.msra.mxu3 %v1183_v10  ;;  %v1248_v4 = vld [vmem:[#allocation4 + $0x118] sm:$0xff] }
 0x45f   :  { %1539 = vst [vmem:[#allocation46_spill] sm:$0xff] %v1248_v4 }
 0x460   :  { %207 = vmatpush.msra.mxu3 %v1191_v45 }
 0x461   :  { %208 = vmatmul.f32.vlgmr.msra.gmra.mxu3 %v1004_v49  ;;  %v1242_v49 = vld [vmem:[#allocation4 + $0x128] sm:$0xff] }
 0x462   :  { %v333_v36 = vpop.permute.xlu1 %332  ;;  %409 = vmatpush.msrb.mxu3 %v863_v3  ;;  %1538 = vst [vmem:[#allocation45_spill] sm:$0xff] %v1242_v49 }
 0x463   :  { %336 = vst.msk [vmem:[#allocation2] sm:$0xff] %vm335_vm14, %v333_v36  ;;  %v1239_v36 = vld [vmem:[#allocation4 + $0x138] sm:$0xff] }
 0x464   :  { %350 = vst.msk [vmem:[#allocation2] sm:$0xff] %vm349_vm15, %v347_v16  ;;  %410 = vmatpush.msrb.mxu3 %v870_v6  ;;  %v1233_v16 = vld [vmem:[#allocation4 + $0x148] sm:$0xff] }
 0x465   :  { %364 = vst.msk [vmem:[#allocation2] sm:$0xff] %vm1499_vm0, %v361_v30  ;;  %v1235_v30 = vld [vmem:[#allocation4 + $0x208] sm:$0xff]  ;;  %223 = vmatpush.msrb.mxu0 %v1233_v16  ;;  %480 = vmatpush.msra.mxu2 %v1233_v16  ;;  %vm541_vm0 = vcmask 97368  }
 0x466   :  { %411 = vmatpush.msrb.mxu3 %v876_v8  ;;  %1535 = vst [vmem:[#allocation42_spill] sm:$0xff] %v1233_v16  ;;  %247 = vmatpush.msrb.mxu1 %v1235_v30  ;;  %v1547_v16 = vmov 0.0  }
 0x467   :  { %1536 = vst [vmem:[#allocation43_spill] sm:$0xff] %v1235_v30  ;;  %224 = vmatpush.msrb.mxu0 %v1239_v36  ;;  %248 = vmatmul.f32.vlgmr.msrb.gmra.mxu1 %v995_v47  ;;  %v1541_v47 = vld [vmem:[#allocation17_spill] sm:$0xff] }
 0x468   :  { %412 = vmatpush.msrb.mxu3 %v885_v11  ;;  %1537 = vst [vmem:[#allocation44_spill] sm:$0xff] %v1239_v36  ;;  %449 = vmatpush.msra.mxu1 %v1062_v59 }
 0x469   :  { %225 = vmatpush.msrb.mxu0 %v1242_v49  ;;  %481 = vmatpush.msra.mxu2 %v1239_v36 }
 0x46a   :  { %413 = vmatpush.msrb.mxu3 %v894_v14  ;;  %450 = vmatpush.msra.mxu1 %v1064_v52 }
 0x46b   :  { %226 = vmatpush.msrb.mxu0 %v1248_v4  ;;  %482 = vmatpush.msra.mxu2 %v1242_v49  ;;  %v1544_v49 = vld [vmem:[#allocation23_spill] sm:$0xff] }
 0x46c   :  { %414 = vmatpush.msrb.mxu3 %v903_v17  ;;  %451 = vmatpush.msra.mxu1 %v1067_v53 }
 0x46d   :  { %483 = vmatpush.msra.mxu2 %v1248_v4  ;;  %v1543_v4 = vld [vmem:[#allocation21_spill] sm:$0xff] }
 0x46e   :  { %415 = vmatpush.msrb.mxu3 %v912_v20  ;;  %452 = vmatpush.msra.mxu1 %v1070_v54 }
 0x470   :  { %416 = vmatpush.msrb.mxu3 %v921_v23  ;;  %453 = vmatpush.msra.mxu1 %v1078_v55 }
 0x472   :  { %417 = vmatpush.msrb.mxu3 %v930_v26  ;;  %454 = vmatpush.msra.mxu1 %v1088_v62 }
 0x474   :  { %418 = vmatpush.msrb.mxu3 %v939_v29  ;;  %455 = vmatpush.msra.mxu1 %v1098_v46 }
 0x476   :  { %419 = vmatpush.msrb.mxu3 %v948_v32  ;;  %456 = vmatpush.msra.mxu1 %v1108_v60 }
 0x478   :  { %420 = vmatpush.msrb.mxu3 %v957_v35  ;;  %457 = vmatpush.msra.mxu1 %v1118_v31 }
 0x47a   :  { %421 = vmatpush.msrb.mxu3 %v966_v38  ;;  %458 = vmatpush.msra.mxu1 %v1128_v25 }
 0x47c   :  { %422 = vmatpush.msrb.mxu3 %v975_v41  ;;  %459 = vmatpush.msra.mxu1 %v1138_v34 }
 0x47e   :  { %423 = vmatpush.msrb.mxu3 %v984_v44  ;;  %460 = vmatpush.msra.mxu1 %v1151_v57 }
 0x480   :  { %424 = vmatpush.msrb.mxu3 %v998_v48  ;;  %461 = vmatpush.msra.mxu1 %v1163_v40 }
 0x482   :  { %489 = vmatpush.msra.mxu3 %v1072_v56  ;;  %462 = vmatpush.msra.mxu1 %v1173_v51 }
 0x484   :  { %490 = vmatpush.msra.mxu3 %v1076_v61  ;;  %463 = vmatpush.msra.mxu1 %v1183_v10 }
 0x486   :  { %491 = vmatpush.msra.mxu3 %v1080_v58  ;;  %464 = vmatpush.msra.mxu1 %v1191_v45 }
 0x488   :  { %492 = vmatpush.msra.mxu3 %v1090_v63  ;;  %650 = vmatpush.msrb.mxu1 %v863_v3  ;;  %v1549_v3 = vld [vmem:[#allocation8_spill] sm:$0xff] }
 0x48a   :  { %493 = vmatpush.msra.mxu3 %v1100_v43  ;;  %651 = vmatpush.msrb.mxu1 %v870_v6  ;;  %v1550_v6 = vld [vmem:[#allocation9_spill] sm:$0xff] }
 0x48c   :  { %494 = vmatpush.msra.mxu3 %v1110_v37  ;;  %652 = vmatpush.msrb.mxu1 %v876_v8  ;;  %v1551_v8 = vld [vmem:[#allocation10_spill] sm:$0xff] }
 0x48e   :  { %495 = vmatpush.msra.mxu3 %v1120_v28  ;;  %653 = vmatpush.msrb.mxu1 %v885_v11  ;;  %v1552_v11 = vld [vmem:[#allocation11_spill] sm:$0xff] }
 0x490   :  { %496 = vmatpush.msra.mxu3 %v1130_v22  ;;  %654 = vmatpush.msrb.mxu1 %v894_v14  ;;  %v1553_v14 = vld [vmem:[#allocation12_spill] sm:$0xff] }
 0x492   :  { %497 = vmatpush.msra.mxu3 %v1140_v19  ;;  %v1254_v19 = vld [vmem:[#allocation4 + $0x108] sm:$0xff]  ;;  %655 = vmatpush.msrb.mxu1 %v903_v17  ;;  %v1554_v17 = vld [vmem:[#allocation13_spill] sm:$0xff] }
 0x493   :  { %1540 = vst [vmem:[#allocation47_spill] sm:$0xff] %v1254_v19  ;;  %227 = vmatpush.msrb.mxu0 %v1254_v19  ;;  %484 = vmatpush.msra.mxu2 %v1254_v19  ;;  %v1542_v19 = vld [vmem:[#allocation19_spill] sm:$0xff] }
 0x494   :  { %498 = vmatpush.msra.mxu3 %v1154_v13  ;;  %228 = vmatmul.f32.vlgmr.msrb.gmra.mxu0 %v1009_v50 }
 0x495   :  { %429 = vmatpush.msra.mxu0 %v855_v0  ;;  %656 = vmatpush.msrb.mxu1 %v912_v20 }
 0x496   :  { %499 = vmatpush.msra.mxu3 %v1165_v2 }
 0x497   :  { %430 = vmatpush.msra.mxu0 %v857_v1  ;;  %657 = vmatpush.msrb.mxu1 %v921_v23  ;;  %v1555_v23 = vld [vmem:[#allocation14_spill] sm:$0xff] }
 0x498   :  { %500 = vmatpush.msra.mxu3 %v1175_v42 }
 0x499   :  { %431 = vmatpush.msra.mxu0 %v868_v5  ;;  %658 = vmatpush.msrb.mxu1 %v930_v26  ;;  %v1556_v26 = vld [vmem:[#allocation15_spill] sm:$0xff] }
 0x49a   :  { %501 = vmatpush.msra.mxu3 %v1185_v39 }
 0x49b   :  { %432 = vmatpush.msra.mxu0 %v879_v9  ;;  %659 = vmatpush.msrb.mxu1 %v939_v29  ;;  %v1557_v29 = vld [vmem:[#allocation16_spill] sm:$0xff] }
 0x49c   :  { %502 = vmatpush.msra.mxu3 %v1193_v7 }
 0x49d   :  { %433 = vmatpush.msra.mxu0 %v888_v12  ;;  %660 = vmatpush.msrb.mxu1 %v948_v32  ;;  %v1558_v32 = vld [vmem:[#allocation18_spill] sm:$0xff] }
 0x49e   :  { %503 = vmatpush.msra.mxu3 %v1200_v33  ;;  %v1546_v33 = vld [vmem:[#allocation27_spill] sm:$0xff] }
 0x49f   :  { %434 = vmatpush.msra.mxu0 %v897_v15  ;;  %661 = vmatpush.msrb.mxu1 %v957_v35 }
 0x4a0   :  { %504 = vmatpush.msra.mxu3 %v1235_v30  ;;  %v1545_v30 = vld [vmem:[#allocation25_spill] sm:$0xff] }
 0x4a1   :  { %435 = vmatpush.msra.mxu0 %v906_v18  ;;  %662 = vmatpush.msrb.mxu1 %v966_v38  ;;  %v1560_v38 = vld [vmem:[#allocation22_spill] sm:$0xff] }
 0x4a3   :  { %436 = vmatpush.msra.mxu0 %v915_v21  ;;  %663 = vmatpush.msrb.mxu1 %v975_v41  ;;  %v1565_v41 = vld [vmem:[#allocation30_spill] sm:$0xff] }
 0x4a5   :  { %437 = vmatpush.msra.mxu0 %v924_v24  ;;  %664 = vmatpush.msrb.mxu1 %v984_v44 }
 0x4a7   :  { %438 = vmatpush.msra.mxu0 %v933_v27  ;;  %665 = vmatpush.msrb.mxu1 %v998_v48 }
 0x4a9   :  { %439 = vmatpush.msra.mxu0 %v1541_v47 }
 0x4ab   :  { %440 = vmatpush.msra.mxu0 %v1542_v19 }
 0x4ad   :  { %441 = vmatpush.msra.mxu0 %v1543_v4 }
 0x4af   :  { %442 = vmatpush.msra.mxu0 %v1544_v49 }
 0x4b1   :  { %443 = vmatpush.msra.mxu0 %v1545_v30 }
 0x4b3   :  { %444 = vmatpush.msra.mxu0 %v1546_v33 }
 0x4b4   :  { %445 = vmatmul.f32.vlgmr.msra.gmra.mxu0 %v1547_v16 }
 0x4b5   :  { %v382_v50 = vpop.permute.xlu2 %381 }
 0x4b6   :  { %385 = vst.msk [vmem:[#allocation2 + $0x8] sm:$0xff] %vm384_vm10, %v382_v50  ;;  %v1548_v50 = vld [vmem:[#allocation7_spill] sm:$0xff]  ;;  %vm1497_vm10 = vcmask 982968  }
 0x4b7   :  { %630 = vmatpush.msrb.mxu0 %v1548_v50 }
 0x4b9   :  { %631 = vmatpush.msrb.mxu0 %v1549_v3 }
 0x4bb   :  { %632 = vmatpush.msrb.mxu0 %v1550_v6 }
 0x4bd   :  { %v387_v36 = vld [vmem:[#allocation2 + $0x8] sm:$0xff]  ;;  %633 = vmatpush.msrb.mxu0 %v1551_v8 }
 0x4be   :  { %425 = vmatmul.f32.vlgmr.msrb.gmra.mxu3 %v387_v36 }
 0x4bf   :  { %690 = vmatpush.msrb.mxu3 %v1062_v59  ;;  %634 = vmatpush.msrb.mxu0 %v1552_v11 }
 0x4c1   :  { %691 = vmatpush.msrb.mxu3 %v1064_v52  ;;  %635 = vmatpush.msrb.mxu0 %v1553_v14 }
 0x4c3   :  { %692 = vmatpush.msrb.mxu3 %v1067_v53  ;;  %636 = vmatpush.msrb.mxu0 %v1554_v17 }
 0x4c5   :  { %693 = vmatpush.msrb.mxu3 %v1070_v54  ;;  %637 = vmatpush.msrb.mxu0 %v1555_v23 }
 0x4c6   :  { %505 = vmatmul.f32.vlgmr.msra.gmra.mxu3 %v1547_v16 }
 0x4c7   :  { %694 = vmatpush.msrb.mxu3 %v1078_v55  ;;  %638 = vmatpush.msrb.mxu0 %v1556_v26 }
 0x4c9   :  { %695 = vmatpush.msrb.mxu3 %v1088_v62  ;;  %639 = vmatpush.msrb.mxu0 %v1557_v29 }
 0x4cb   :  { %696 = vmatpush.msrb.mxu3 %v1098_v46  ;;  %640 = vmatpush.msrb.mxu0 %v1558_v32  ;;  %v1559_v46 = vld [vmem:[#allocation20_spill] sm:$0xff] }
 0x4cd   :  { %v375_v20 = vpop.permute.xlu1 %374  ;;  %697 = vmatpush.msrb.mxu3 %v1108_v60  ;;  %641 = vmatpush.msrb.mxu0 %v1559_v46 }
 0x4ce   :  { %378 = vst.msk [vmem:[#allocation2] sm:$0xff] %vm1497_vm10, %v375_v20  ;;  %vm509_vm10 = vcmask 80896  }
 0x4cf   :  { %698 = vmatpush.msrb.mxu3 %v1118_v31  ;;  %642 = vmatpush.msrb.mxu0 %v1560_v38  ;;  %v1561_v31 = vld [vmem:[#allocation24_spill] sm:$0xff] }
 0x4d1   :  { %699 = vmatpush.msrb.mxu3 %v1128_v25  ;;  %643 = vmatpush.msrb.mxu0 %v1561_v31  ;;  %v1562_v25 = vld [vmem:[#allocation26_spill] sm:$0xff] }
 0x4d3   :  { %700 = vmatpush.msrb.mxu3 %v1138_v34  ;;  %644 = vmatpush.msrb.mxu0 %v1562_v25 }
 0x4d5   :  { %v386_v35 = vld [vmem:[#allocation2] sm:$0xff]  ;;  %701 = vmatpush.msrb.mxu3 %v1151_v57 }
 0x4d6   :  { %405 = vmatmul.f32.vlgmr.msrb.gmra.mxu2 %v386_v35  ;;  %465 = vmatmul.f32.vlgmr.msra.gmra.mxu1 %v386_v35 }
 0x4d7   :  { %670 = vmatpush.msrb.mxu2 %v855_v0  ;;  %730 = vmatpush.msra.mxu1 %v1072_v56  ;;  %v1563_v0 = vld [vmem:[#allocation28_spill] sm:$0xff] }
 0x4d8   :  { %702 = vmatpush.msrb.mxu3 %v1163_v40  ;;  %645 = vmatpush.msrb.mxu0 %v1563_v0  ;;  %v1580_v40 = vld [vmem:[#allocation45_spill] sm:$0xff] }
 0x4d9   :  { %671 = vmatpush.msrb.mxu2 %v857_v1  ;;  %731 = vmatpush.msra.mxu1 %v1076_v61  ;;  %v1564_v1 = vld [vmem:[#allocation29_spill] sm:$0xff] }
 0x4da   :  { %710 = vmatpush.msra.mxu0 %v1564_v1  ;;  %703 = vmatpush.msrb.mxu3 %v1173_v51 }
 0x4db   :  { %672 = vmatpush.msrb.mxu2 %v868_v5  ;;  %732 = vmatpush.msra.mxu1 %v1080_v58  ;;  %v1566_v5 = vld [vmem:[#allocation31_spill] sm:$0xff] }
 0x4dc   :  { %711 = vmatpush.msra.mxu0 %v1565_v41  ;;  %704 = vmatpush.msrb.mxu3 %v1183_v10 }
 0x4dd   :  { %673 = vmatpush.msrb.mxu2 %v879_v9  ;;  %733 = vmatpush.msra.mxu1 %v1090_v63  ;;  %v1567_v9 = vld [vmem:[#allocation32_spill] sm:$0xff] }
 0x4de   :  { %485 = vmatmul.f32.vlgmr.msra.gmra.mxu2 %v387_v36  ;;  %712 = vmatpush.msra.mxu0 %v1566_v5 }
 0x4df   :  { %674 = vmatpush.msrb.mxu2 %v888_v12  ;;  %734 = vmatpush.msra.mxu1 %v1100_v43  ;;  %v1568_v12 = vld [vmem:[#allocation33_spill] sm:$0xff] }
 0x4e0   :  { %713 = vmatpush.msra.mxu0 %v1567_v9  ;;  %705 = vmatpush.msrb.mxu3 %v1191_v45 }
 0x4e1   :  { %675 = vmatpush.msrb.mxu2 %v897_v15  ;;  %735 = vmatpush.msra.mxu1 %v1110_v37  ;;  %v1569_v15 = vld [vmem:[#allocation34_spill] sm:$0xff]  ;;  %v1571_v37 = vld [vmem:[#allocation35_spill] sm:$0xff] }
 0x4e2   :  { %714 = vmatpush.msra.mxu0 %v1568_v12 }
 0x4e3   :  { %676 = vmatpush.msrb.mxu2 %v906_v18  ;;  %736 = vmatpush.msra.mxu1 %v1120_v28  ;;  %v1570_v18 = vld [vmem:[#allocation36_spill] sm:$0xff]  ;;  %v1579_v28 = vld [vmem:[#allocation43_spill] sm:$0xff] }
 0x4e4   :  { %715 = vmatpush.msra.mxu0 %v1569_v15  ;;  %v209_v43 = vpop.f32.mrf.mxu3 }
 0x4e5   :  { %677 = vmatpush.msrb.mxu2 %v915_v21  ;;  %737 = vmatpush.msra.mxu1 %v1130_v22  ;;  %v1572_v21 = vld [vmem:[#allocation37_spill] sm:$0xff]  ;;  %v1574_v22 = vld [vmem:[#allocation39_spill] sm:$0xff] }
 0x4e6   :  { %716 = vmatpush.msra.mxu0 %v1571_v37 }
 0x4e7   :  { %678 = vmatpush.msrb.mxu2 %v924_v24  ;;  %738 = vmatpush.msra.mxu1 %v1570_v18  ;;  %v1573_v24 = vld [vmem:[#allocation38_spill] sm:$0xff] }
 0x4e8   :  { %717 = vmatpush.msra.mxu0 %v1572_v21 }
 0x4e9   :  { %679 = vmatpush.msrb.mxu2 %v933_v27  ;;  %739 = vmatpush.msra.mxu1 %v1154_v13  ;;  %v1575_v27 = vld [vmem:[#allocation40_spill] sm:$0xff]  ;;  %v1576_v13 = vld [vmem:[#allocation42_spill] sm:$0xff] }
 0x4ea   :  { %718 = vmatpush.msra.mxu0 %v1573_v24 }
 0x4eb   :  { %680 = vmatpush.msrb.mxu2 %v1541_v47  ;;  %740 = vmatpush.msra.mxu1 %v1165_v2  ;;  %v1577_v2 = vld [vmem:[#allocation41_spill] sm:$0xff]  ;;  %v249_v47 = vpop.f32.mrf.mxu1 }
 0x4ec   :  { %719 = vmatpush.msra.mxu0 %v1574_v22 }
 0x4ed   :  { %681 = vmatpush.msrb.mxu2 %v1542_v19  ;;  %741 = vmatpush.msra.mxu1 %v1175_v42  ;;  %v1578_v19 = vld [vmem:[#allocation44_spill] sm:$0xff]  ;;  %v1582_v42 = vld [vmem:[#allocation47_spill] sm:$0xff] }
 0x4ee   :  { %720 = vmatpush.msra.mxu0 %v1575_v27 }
 0x4ef   :  { %682 = vmatpush.msrb.mxu2 %v1543_v4  ;;  %742 = vmatpush.msra.mxu1 %v1185_v39  ;;  %v1581_v39 = vld [vmem:[#allocation46_spill] sm:$0xff] }
 0x4f0   :  { %721 = vmatpush.msra.mxu0 %v1576_v13 }
 0x4f1   :  { %683 = vmatpush.msrb.mxu2 %v1544_v49  ;;  %743 = vmatpush.msra.mxu1 %v1193_v7 }
 0x4f2   :  { %722 = vmatpush.msra.mxu0 %v1578_v19 }
 0x4f3   :  { %684 = vmatpush.msrb.mxu2 %v1545_v30  ;;  %744 = vmatpush.msra.mxu1 %v1577_v2 }
 0x4f4   :  { %723 = vmatpush.msra.mxu0 %v1580_v40 }
 0x4f5   :  { %685 = vmatpush.msrb.mxu2 %v1546_v33  ;;  %745 = vmatpush.msra.mxu1 %v1579_v28 }
 0x4f6   :  { %686 = vmatmul.f32.vlgmr.msrb.gmra.mxu2 %v1547_v16  ;;  %724 = vmatpush.msra.mxu0 %v1581_v39 }
 0x4f8   :  { %725 = vmatpush.msra.mxu0 %v1582_v42 }
 0x511   :  { %v229_v7 = vpop.f32.mrf.mxu0 }
 0x512   :  { %v230_v44 = vadd.f32 %v229_v7, %v209_v43 }
 0x514   :  { %v250_v50 = vadd.f32 %v249_v47, %v230_v44 }
 0x531   :  { %v446_v48 = vpop.f32.mrf.mxu0 }
 0x541   :  { %v426_v59 = vpop.f32.mrf.mxu3 }
 0x549   :  { %v506_v32 = vpop.f32.mrf.mxu3 }
 0x553   :  { %v466_v26 = vpop.f32.mrf.mxu1 }
 0x559   :  { %v406_v33 = vpop.f32.mrf.mxu2 }
 0x55a   :  { %v427_v52 = vadd.f32 %v426_v59, %v406_v33 }
 0x55c   :  { %v447_v53 = vadd.f32 %v446_v48, %v427_v52 }
 0x55e   :  { %510 = vst.msk [vmem:[#allocation3 + $0x8] sm:$0xff] %vm509_vm10, %v447_v53 }
 0x561   :  { %v486_v11 = vpop.f32.mrf.mxu2 }
 0x562   :  { %v487_v29 = vadd.f32 %v486_v11, %v466_v26 }
 0x564   :  { %v507_v35 = vadd.f32 %v506_v32, %v487_v29 }
 0x565   :  { %v523_v54 = vld [vmem:[#allocation3 + $0x8] sm:$0xff] }
 0x566   :  { %525 = vrot.lane.b32.xlu0 %v523_v54, %s817_s0 }
 0x579   :  { %v687_v12 = vpop.f32.mrf.mxu2 }
 0x5d8   :  { %v526_v56 = vpop.permute.xlu0 %525 }
 0x5d9   :  { %529 = vst.msk [vmem:[#allocation3 + $0x8] sm:$0xff] %vm528_vm8, %v526_v56 }
 0x5e0   :  { %v536_v61 = vld [vmem:[#allocation3 + $0x8] sm:$0xff] }
 0x5e1   :  { %538 = vrot.lane.b32.xlu1 %v536_v61, %s818_s21 }
 0x653   :  { %v539_v55 = vpop.permute.xlu1 %538 }
 0x654   :  { %542 = vst.msk [vmem:[#allocation3 + $0x8] sm:$0xff] %vm541_vm0, %v539_v55 }
 0x65b   :  { %v549_v58 = vld [vmem:[#allocation3 + $0x8] sm:$0xff] }
 0x65c   :  { %551 = vrot.lane.b32.xlu2 %v549_v58, %s819_s22 }
 0x6b6   :  { %v552_v60 = vpop.permute.xlu2 %551 }
 0x6b7   :  { %554 = vst.msk [vmem:[#allocation3 + $0x8] sm:$0xff] %vm272_vm1, %v552_v60  ;;  %vm258_vm1 = vcmask 326880  }
 0x6be   :  { %v561_v57 = vld [vmem:[#allocation3 + $0x8] sm:$0xff] }
 0x6bf   :  { %563 = vrot.lane.b32.xlu0 %v561_v57, %s820_s23 }
 0x731   :  { %v564_v62 = vpop.permute.xlu0 %563 }
 0x732   :  { %566 = vst.msk [vmem:[#allocation3 + $0x8] sm:$0xff] %vm286_vm2, %v564_v62  ;;  %vm1583_vm2 = vcmask 991168  }
 0x739   :  { %v573_v63 = vld [vmem:[#allocation3 + $0x8] sm:$0xff] }
 0x73a   :  { %575 = vrot.lane.b32.xlu1 %v573_v63, %s821_s24 }
 0x7ac   :  { %v576_v34 = vpop.permute.xlu1 %575 }
 0x7ad   :  { %578 = vst.msk [vmem:[#allocation3 + $0x8] sm:$0xff] %vm300_vm3, %v576_v34  ;;  %vm1584_vm3 = vcmask 154768  }
 0x7b4   :  { %v585_v51 = vld [vmem:[#allocation3 + $0x8] sm:$0xff] }
 0x7b5   :  { %587 = vrot.lane.b32.xlu2 %v585_v51, %s822_s25 }
 0x7bd   :  { %519 = vrot.lane.b32.xlu2 %v523_v54, %s823_s26 }
 0x7c5   :  { %557 = vrot.lane.b32.xlu2 %v561_v57, %s824_s27 }
 0x80f   :  { %v588_v4 = vpop.permute.xlu2 %587 }
 0x810   :  { %590 = vst.msk [vmem:[#allocation3 + $0x8] sm:$0xff] %vm314_vm4, %v588_v4  ;;  %vm1585_vm4 = vcmask 982968  }
 0x817   :  { %v520_v10 = vpop.permute.xlu2 %519  ;;  %v597_v45 = vld [vmem:[#allocation3 + $0x8] sm:$0xff] }
 0x818   :  { %522 = vst.msk [vmem:[#allocation3] sm:$0xff] %vm265_vm7, %v520_v10  ;;  %599 = vrot.lane.b32.xlu0 %v597_v45, %s825_s28  ;;  %593 = vrot.lane.b32.xlu2 %v597_v45, %s826_s29  ;;  %vm756_vm7 = vcmask 146504  }
 0x81f   :  { %v558_v20 = vpop.permute.xlu2 %557 }
 0x820   :  { %532 = vrot.lane.b32.xlu0 %v536_v61, %s827_s30 }
 0x828   :  { %569 = vrot.lane.b32.xlu0 %v573_v63, %s828_s3 }
 0x872   :  { %v594_v38 = vpop.permute.xlu2 %593 }
 0x88a   :  { %v600_v30 = vpop.permute.xlu0 %599 }
 0x88b   :  { %602 = vst.msk [vmem:[#allocation3 + $0x8] sm:$0xff] %vm328_vm5, %v600_v30  ;;  %vm515_vm5 = vcmask 228496  }
 0x892   :  { %v533_v36 = vpop.permute.xlu0 %532  ;;  %v609_v49 = vld [vmem:[#allocation3 + $0x8] sm:$0xff] }
 0x893   :  { %535 = vst.msk [vmem:[#allocation3] sm:$0xff] %vm279_vm9, %v533_v36  ;;  %611 = vrot.lane.b32.xlu1 %v609_v49, %s829_s4  ;;  %605 = vrot.lane.b32.xlu0 %v609_v49, %s830_s5 }
 0x89a   :  { %v570_v3 = vpop.permute.xlu0 %569 }
 0x89b   :  { %545 = vrot.lane.b32.xlu1 %v549_v58, %s831_s6  ;;  %255 = vrot.lane.b32.xlu0 %v250_v50, %s835_s10 }
 0x8a3   :  { %581 = vrot.lane.b32.xlu1 %v585_v51, %s832_s7 }
 0x905   :  { %v612_v6 = vpop.permute.xlu1 %611  ;;  %v606_v8 = vpop.permute.xlu0 %605 }
 0x906   :  { %614 = vst.msk [vmem:[#allocation3 + $0x8] sm:$0xff] %vm342_vm6, %v612_v6  ;;  %vm750_vm6 = vcmask 72704  }
 0x90d   :  { %v546_v14 = vpop.permute.xlu1 %545  ;;  %v621_v17 = vld [vmem:[#allocation3 + $0x8] sm:$0xff]  ;;  %v256_v23 = vpop.permute.xlu0 %255 }
 0x90e   :  { %548 = vst.msk [vmem:[#allocation3] sm:$0xff] %vm293_vm11, %v546_v14  ;;  %623 = vrot.lane.b32.xlu2 %v621_v17, %s833_s8  ;;  %617 = vrot.lane.b32.xlu1 %v621_v17, %s834_s9 }
 0x90f   :  { %560 = vst.msk [vmem:[#allocation3] sm:$0xff] %vm307_vm12, %v558_v20 }
 0x910   :  { %572 = vst.msk [vmem:[#allocation3] sm:$0xff] %vm321_vm13, %v570_v3 }
 0x911   :  { %259 = vst.msk [vmem:[%s1447_s2] sm:$0xff] %vm258_vm1, %v256_v23 }
 0x915   :  { %v582_v46 = vpop.permute.xlu1 %581 }
 0x916   :  { %584 = vst.msk [vmem:[#allocation3] sm:$0xff] %vm335_vm14, %v582_v46  ;;  %512 = vrot.lane.b32.xlu1 %v507_v35, %s836_s13 }
 0x917   :  { %596 = vst.msk [vmem:[#allocation3] sm:$0xff] %vm349_vm15, %v594_v38 }
 0x918   :  { %608 = vst.msk [vmem:[#allocation3] sm:$0xff] %vm1583_vm2, %v606_v8 }
 0x968   :  { %v624_v31 = vpop.permute.xlu2 %623 }
 0x969   :  { %626 = vst.msk [vmem:[#allocation3 + $0x8] sm:$0xff] %vm1584_vm3, %v624_v31 }
 0x970   :  { %v628_v25 = vld [vmem:[#allocation3 + $0x8] sm:$0xff] }
 0x971   :  { %666 = vmatmul.f32.vlgmr.msrb.gmra.mxu1 %v628_v25 }
 0x979   :  { %746 = vmatmul.f32.vlgmr.msra.gmra.mxu1 %v1547_v16 }
 0x980   :  { %v618_v0 = vpop.permute.xlu1 %617 }
 0x981   :  { %620 = vst.msk [vmem:[#allocation3] sm:$0xff] %vm1585_vm4, %v618_v0 }
 0x988   :  { %v513_v1 = vpop.permute.xlu1 %512  ;;  %v627_v41 = vld [vmem:[#allocation3] sm:$0xff] }
 0x989   :  { %516 = vst.msk [vmem:[%s1447_s2] sm:$0xff] %vm515_vm5, %v513_v1  ;;  %646 = vmatmul.f32.vlgmr.msrb.gmra.mxu0 %v627_v41  ;;  %706 = vmatmul.f32.vlgmr.msrb.gmra.mxu3 %v627_v41 }
 0x991   :  { %726 = vmatmul.f32.vlgmr.msra.gmra.mxu0 %v628_v25 }
 0x9ee   :  { %v667_v5 = vpop.f32.mrf.mxu1 }
 0x9f6   :  { %v747_v16 = vpop.f32.mrf.mxu1 }
 0xa06   :  { %v647_v9 = vpop.f32.mrf.mxu0 }
 0xa07   :  { %v668_v15 = vadd.f32 %v667_v5, %v647_v9 }
 0xa09   :  { %v688_v18 = vadd.f32 %v687_v12, %v668_v15 }
 0xa0b   :  { %751 = vst.msk [vmem:[%s1447_s2] sm:$0xff] %vm750_vm6, %v688_v18 }
 0xa0c   :  { %v707_v37 = vpop.f32.mrf.mxu3 }
 0xa0e   :  { %v727_v21 = vpop.f32.mrf.mxu0 }
 0xa0f   :  { %v728_v24 = vadd.f32 %v727_v21, %v707_v37 }
 0xa11   :  { %v748_v22 = vadd.f32 %v747_v16, %v728_v24 }
 0xa13   :  { %753 = vrot.lane.b32.xlu2 %v748_v22, %s821_s24 }
 0xa6d   :  { %v754_v27 = vpop.permute.xlu2 %753 }
 0xa6e   :  { %757 = vst.msk [vmem:[%s1447_s2] sm:$0xff] %vm756_vm7, %v754_v27 }
 0xa6f   :  { %762 = vsyncpa [#allocation5], 1 }

</bundles_post_ra>
